<compile_context>
chip_gen: v6e
topology: v6e:2x2x1
jax: 0.10.0
libtpu: 0.0.40
codegen_flags: <defaults>
</compile_context>

<pallas_src>
import numpy as np

import jax
import jax.numpy as jnp
from jax import lax
from jax.experimental import pallas as pl
from jax.experimental.pallas import tpu as pltpu

DIMS = (16, 16, 8)          # SMALL_MODEL = False
LEAK = 0.1
BN_EPS = 1e-5
BLOCK = 8                   # images per grid step (multiple of 8 -> aligned)

assert DIMS == (16, 16, 8), "layout constants below assume the non-small model"
W1C = 8 * DIMS[0]           # 128: width*channels of a layer-2 input row
W2C = 8 * DIMS[1]           # 128: width*channels of a layer-3 input row
W3C = 14 * DIMS[2]          # 112: width*channels of a layer-4 input row
W3CP = 128                  # lane-padded layer-4 input row width


def _leaky(x):
    return jnp.where(x >= 0.0, x, LEAK * x)


# ----------------------------- Pallas kernel ------------------------------- #
def _generator_kernel(z_ref, w1_ref, b1_ref, w2_ref, b2_ref, w3_ref, b3_ref,
                      w4_ref, o_ref, x1_ref, x2_ref, x3_ref):
    """Processes BLOCK images per grid step, (row, image)-interleaved."""
    f32 = jnp.float32
    B = BLOCK

    # ---- Layer 1: Conv(16->16, k4, p3) on a 1x1 input == dense layer.
    #      BN1 and the following nearest 2x upsample (4x4 -> 8x8) are folded
    #      into w1/b1 on the host; one lane-dense matmul gives the whole
    #      (B, 8*8*16) upsampled activation, columns ordered (h, w, c).
    z = z_ref[...]                                                   # (B, 16)
    u1 = _leaky(jnp.dot(z, w1_ref[...], preferred_element_type=f32)
                + b1_ref[...])                                       # (B, 1024)

    # Scatter the 8 activation rows into the height-padded (pad=1),
    # (row, image)-interleaved layer-2 input (width padding folded into w2).
    # 8 aligned full-(8,128)-tile stores (lane slices at 128 boundaries).
    x1_ref[0:B, :] = jnp.zeros((B, W1C), f32)
    x1_ref[9 * B:10 * B, :] = jnp.zeros((B, W1C), f32)
    for h in range(8):
        x1_ref[(1 + h) * B:(2 + h) * B, :] = u1[:, h * W1C:(h + 1) * W1C]

    # ---- Layer 2: Conv(16->16, k3, p1) + BN2 + LeakyReLU.
    #      The 3 kernel-row banded matmuls are fused into one (K = 384).
    x2in = jnp.concatenate(
        [x1_ref[i * B:(i + 8) * B, :] for i in range(3)], axis=1)    # (8B, 384)
    act2 = _leaky(jnp.dot(x2in, w2_ref[...], preferred_element_type=f32)
                  + b2_ref[...])                                     # (8B, 128)

    # Nearest 2x upsample, height half (width half folded into w3):
    # one bulk broadcast + aligned full store.
    up2 = jnp.broadcast_to(act2.reshape(8, 1, B, W2C), (8, 2, B, W2C))
    x2_ref[...] = up2.reshape(16 * B, W2C)

    # ---- Layer 3: Conv(16->8, k3, p0) + BN3 + LeakyReLU (fused, K = 384).
    #      Output rows (14*8 = 112 lanes) are zero-padded to 128 lanes via
    #      zero weight columns, so downstream stores/concats stay aligned.
    x3in = jnp.concatenate(
        [x2_ref[i * B:(i + 14) * B, :] for i in range(3)], axis=1)   # (14B, 384)
    act3 = _leaky(jnp.dot(x3in, w3_ref[...], preferred_element_type=f32)
                  + b3_ref[...])                                     # (14B, 128)

    # Nearest 2x upsample (height half) + height zero-pad 2 for layer 4.
    x3_ref[0:2 * B, :] = jnp.zeros((2 * B, W3CP), f32)
    x3_ref[30 * B:32 * B, :] = jnp.zeros((2 * B, W3CP), f32)
    up3 = jnp.broadcast_to(act3.reshape(14, 1, B, W3CP), (14, 2, B, W3CP))
    x3_ref[2 * B:30 * B, :] = up3.reshape(28 * B, W3CP)

    # ---- Layer 4: Conv(8->1, k5, p2) + Sigmoid (fused banded matmul, K=640).
    x4in = jnp.concatenate(
        [x3_ref[i * B:(i + 28) * B, :] for i in range(5)], axis=1)   # (28B, 640)
    acc4 = jnp.dot(x4in, w4_ref[...], preferred_element_type=f32)    # (28B, 28)
    # Exact reciprocal (approx=True would break the tight reference check).
    img = pl.reciprocal(1.0 + jnp.exp(-acc4))
    o_ref[0] = img.astype(o_ref.dtype)


# --------------------- Host-side weight preparation ------------------------ #
def _bn_fold(bn, eps=BN_EPS):
    gamma, beta, mean, var = (np.asarray(t, np.float32) for t in bn)
    scale = gamma / np.sqrt(var + eps)
    bias = beta - mean * scale
    return scale, bias


def _banded_rows(w_oihw, scale, w_stored, w_up, w_out, pad, dup):
    """Per-kernel-row banded matrices (KH, w_stored*Cin, w_out*Cout).

    Maps one stored activation row (width-major, channel-minor) to one output
    row, with the BN scale, the width zero-padding and (if dup=2) the width
    half of the preceding nearest 2x upsample folded in.
    """
    w = np.asarray(w_oihw, np.float32)
    cout, cin, kh, kw = w.shape
    w = w * scale[:, None, None, None]
    out = np.zeros((kh, w_stored * cin, w_out * cout), np.float32)
    for i in range(kh):
        for wo in range(w_out):
            for j in range(kw):
                b = wo + j                       # padded input column
                if b < pad or b >= pad + w_up:
                    continue                     # zero-padded column
                ws = (b - pad) // dup            # pre-upsample stored column
                out[i, ws * cin:(ws + 1) * cin,
                    wo * cout:(wo + 1) * cout] += w[:, :, i, j].T
    return out


def prepare_generator_weights(params):
    d0, d1, d2 = DIMS
    s1, b1 = _bn_fold(params["bn1"])
    s2, b2 = _bn_fold(params["bn2"])
    s3, b3 = _bn_fold(params["bn3"])

    # Layer 1: dense map latent -> (already 2x-upsampled) 8x8xd0 activation.
    w1 = np.asarray(params["w1"], np.float32)             # (d0, 16, 4, 4)
    w1u = np.zeros((16, 8 * 8 * d0), np.float32)
    b1u = np.zeros((1, 8 * 8 * d0), np.float32)
    for h in range(8):
        for w_ in range(8):
            col = (h * 8 + w_) * d0
            # conv1 output pixel (h//2, w//2) uses kernel tap (3-h//2, 3-w//2)
            w1u[:, col:col + d0] = (w1[:, :, 3 - h // 2, 3 - w_ // 2]
                                    * s1[:, None]).T
            b1u[0, col:col + d0] = b1

    # Layer 2: banded kernel-row matrices stacked along contraction.
    w2r = _banded_rows(params["w2"], s2, w_stored=8, w_up=8, w_out=8,
                       pad=1, dup=1)                      # (3, 128, 128)
    w2c = w2r.reshape(3 * 8 * d0, 8 * d1)                 # (384, 128)
    b2r = np.tile(b2, 8)[None, :]                         # (1, 128)

    # Layer 3: stacked along contraction, output lane-padded 112 -> 128.
    w3r = _banded_rows(params["w3"], s3, w_stored=8, w_up=16, w_out=14,
                       pad=0, dup=2)                      # (3, 128, 112)
    w3c = w3r.reshape(3 * 8 * d1, 14 * d2)
    w3c = np.pad(w3c, ((0, 0), (0, W3CP - 14 * d2)))      # (384, 128)
    b3r = np.pad(np.tile(b3, 14), (0, W3CP - 14 * d2))[None, :]   # (1, 128)

    # Layer 4: pad each block's rows 112 -> 128 (matching the lane-padded x3
    # scratch) and stack the 5 kernel-row blocks along contraction.
    w4r = _banded_rows(params["w4"], np.ones((1,), np.float32),
                       w_stored=14, w_up=28, w_out=28, pad=2, dup=2)  # (5,112,28)
    w4r = np.pad(w4r, ((0, 0), (0, W3CP - 14 * d2), (0, 0)))         # (5,128,28)
    w4c = w4r.reshape(5 * W3CP, 28)                                   # (640, 28)

    return tuple(jnp.asarray(a) for a in (w1u, b1u, w2c, b2r, w3c, b3r, w4c))


# ------------------------------- Forward ----------------------------------- #
@jax.jit
def _generator_pallas(z, w1u, b1u, w2c, b2r, w3c, b3r, w4c):
    n = z.shape[0]
    B = BLOCK
    g = (n + B - 1) // B
    n_pad = g * B
    if n_pad != n:
        z = jnp.pad(z, ((0, n_pad - n), (0, 0)))

    out = pl.pallas_call(
        _generator_kernel,
        out_shape=jax.ShapeDtypeStruct((g, 28 * B, 28), jnp.float32),
        grid=(g,),
        in_specs=[
            pl.BlockSpec((B, 16), lambda i: (i, 0)),
            pl.BlockSpec(w1u.shape, lambda i: (0, 0)),
            pl.BlockSpec(b1u.shape, lambda i: (0, 0)),
            pl.BlockSpec(w2c.shape, lambda i: (0, 0)),
            pl.BlockSpec(b2r.shape, lambda i: (0, 0)),
            pl.BlockSpec(w3c.shape, lambda i: (0, 0)),
            pl.BlockSpec(b3r.shape, lambda i: (0, 0)),
            pl.BlockSpec(w4c.shape, lambda i: (0, 0)),
        ],
        out_specs=pl.BlockSpec((1, 28 * B, 28), lambda i: (i, 0, 0)),
        scratch_shapes=[
            pltpu.VMEM((10 * B, W1C), jnp.float32),   # padded layer-2 input rows
            pltpu.VMEM((16 * B, W2C), jnp.float32),   # upsampled layer-3 input
            pltpu.VMEM((32 * B, W3CP), jnp.float32),  # upsampled+padded layer-4 input
        ],
        compiler_params=pltpu.CompilerParams(
            dimension_semantics=("parallel",)),
    )(z, w1u, b1u, w2c, b2r, w3c, b3r, w4c)

    # De-interleave (row, image) -> image-major NCHW in the wrapper (tiny op).
    img = out.reshape(g, 28, B, 28).transpose(0, 2, 1, 3)
    return img.reshape(n_pad, 1, 28, 28)[:n]


def generator_forward(params, z):
    """z: (N, 16) latent -> (N, 1, 28, 28) image (NCHW, matching PyTorch)."""
    prep = prepare_generator_weights(params)
    return _generator_pallas(z, *prep)


# ------------------------------ Parameters --------------------------------- #
def init_params(key):
    dims = list(DIMS)  # SMALL_MODEL = False

    def conv_w(k, cout, cin, kh, kw):
        fan_in = cin * kh * kw
        bound = 1.0 / jnp.sqrt(fan_in)
        return jax.random.uniform(k, (cout, cin, kh, kw), jnp.float32, -bound, bound)

    def bn(k, c):
        kg, kb, km, kv = jax.random.split(k, 4)
        gamma = 1.0 + 0.1 * jax.random.normal(kg, (c,), jnp.float32)
        beta = 0.1 * jax.random.normal(kb, (c,), jnp.float32)
        mean = 0.1 * jax.random.normal(km, (c,), jnp.float32)
        var = jnp.abs(jax.random.normal(kv, (c,), jnp.float32)) + 0.5
        return gamma, beta, mean, var

    ks = jax.random.split(key, 7)
    return {
        "w1": conv_w(ks[0], dims[0], 16, 4, 4),
        "bn1": bn(ks[1], dims[0]),
        "w2": conv_w(ks[2], dims[1], dims[0], 3, 3),
        "bn2": bn(ks[3], dims[1]),
        "w3": conv_w(ks[4], dims[2], dims[1], 3, 3),
        "bn3": bn(ks[5], dims[2]),
        "w4": conv_w(ks[6], 1, dims[2], 5, 5),
    }


# -------------------------- Pure-JAX reference ----------------------------- #
def upsample2x(x_nhwc):
    # nn.Upsample(scale_factor=2) default mode='nearest'
    return jnp.repeat(jnp.repeat(x_nhwc, 2, axis=1), 2, axis=2)


def reference_forward(params, z):
    """Pure-JAX reference (lax.conv) used only for the correctness check."""
    def conv(x, w, pad):
        w_hwio = jnp.transpose(w, (2, 3, 1, 0))
        return lax.conv_general_dilated(
            x, w_hwio, window_strides=(1, 1),
            padding=((pad, pad), (pad, pad)),
            dimension_numbers=("NHWC", "HWIO", "NHWC"),
            precision=lax.Precision.HIGHEST)

    def bn(x, p, eps=BN_EPS):
        gamma, beta, mean, var = p
        return (x - mean) / jnp.sqrt(var + eps) * gamma + beta

    def lrelu(x):
        return jnp.where(x >= 0, x, LEAK * x)

    n = z.shape[0]
    x = z.reshape(n, 1, 1, 16)
    x = lrelu(bn(conv(x, params["w1"], 3), params["bn1"]))
    x = upsample2x(x)
    x = lrelu(bn(conv(x, params["w2"], 1), params["bn2"]))
    x = upsample2x(x)
    x = lrelu(bn(conv(x, params["w3"], 0), params["bn3"]))
    x = upsample2x(x)
    x = conv(x, params["w4"], 2)
    x = 1.0 / (1.0 + jnp.exp(-x))
    return jnp.transpose(x, (0, 3, 1, 2))


# --------------------------------- Main ------------------------------------ #
if __name__ == "__main__":
    key = jax.random.PRNGKey(0)
    kp, kz = jax.random.split(key)
    params = init_params(kp)
    # N = 13 exercises the pad-to-block path; grid = (2,) (even, v7x-friendly).
    z = jax.random.normal(kz, (13, 16), jnp.float32)

    out = generator_forward(params, z)
    out = jax.block_until_ready(out)
    assert out.shape == (13, 1, 28, 28), out.shape

    ref = reference_forward(params, z)
    err = float(jnp.max(jnp.abs(out - ref)))
    assert err < 5e-5, f"max abs error vs reference: {err}"

    print("KERNEL_OK")
</pallas_src>

<mosaic_0001>
module attributes {stable_mosaic.version = 11 : i64} {
  func.func @_generator_kernel(%arg0: i32, %arg1: memref<8x16xf32, #tpu.memory_space<vmem>>, %arg2: memref<16x1024xf32, #tpu.memory_space<vmem>>, %arg3: memref<1x1024xf32, #tpu.memory_space<vmem>>, %arg4: memref<384x128xf32, #tpu.memory_space<vmem>>, %arg5: memref<1x128xf32, #tpu.memory_space<vmem>>, %arg6: memref<384x128xf32, #tpu.memory_space<vmem>>, %arg7: memref<1x128xf32, #tpu.memory_space<vmem>>, %arg8: memref<640x28xf32, #tpu.memory_space<vmem>>, %arg9: memref<1x224x28xf32, #tpu.memory_space<vmem>>, %arg10: memref<80x128xf32, #tpu.memory_space<vmem>>, %arg11: memref<128x128xf32, #tpu.memory_space<vmem>>, %arg12: memref<256x128xf32, #tpu.memory_space<vmem>>) attributes {dimension_semantics = [#tpu.dimension_semantics<parallel>], iteration_bounds = array<i64: 2>, scalar_prefetch = 0 : i64, scratch_operands = 3 : i64, tpu.core_type = #tpu.core_type<tc>, window_params = [{transform_indices = @transform_0, window_bounds = array<i64: 8, 16>}, {pipeline_mode = #tpu.pipeline_mode<synchronous>, transform_indices = @transform_1, window_bounds = array<i64: 16, 1024>}, {pipeline_mode = #tpu.pipeline_mode<synchronous>, transform_indices = @transform_2, window_bounds = array<i64: 1, 1024>}, {pipeline_mode = #tpu.pipeline_mode<synchronous>, transform_indices = @transform_3, window_bounds = array<i64: 384, 128>}, {pipeline_mode = #tpu.pipeline_mode<synchronous>, transform_indices = @transform_4, window_bounds = array<i64: 1, 128>}, {pipeline_mode = #tpu.pipeline_mode<synchronous>, transform_indices = @transform_5, window_bounds = array<i64: 384, 128>}, {pipeline_mode = #tpu.pipeline_mode<synchronous>, transform_indices = @transform_6, window_bounds = array<i64: 1, 128>}, {pipeline_mode = #tpu.pipeline_mode<synchronous>, transform_indices = @transform_7, window_bounds = array<i64: 640, 28>}, {transform_indices = @transform_8, window_bounds = array<i64: 1, 224, 28>}]} {
    %c0 = arith.constant 0 : index
    %c0_0 = arith.constant 0 : index
    %0 = vector.load %arg1[%c0, %c0_0] : memref<8x16xf32, #tpu.memory_space<vmem>>, vector<8x16xf32>
    %c0_1 = arith.constant 0 : index
    %c0_2 = arith.constant 0 : index
    %1 = vector.load %arg2[%c0_1, %c0_2] : memref<16x1024xf32, #tpu.memory_space<vmem>>, vector<16x1024xf32>
    %cst = arith.constant dense<0.000000e+00> : vector<8x1024xf32>
    %2 = tpu.matmul %0, %1, %cst {dimension_numbers = #tpu.dot_dimension_numbers<[1], [0], [0], [1], [0, 0, 1, 1], [], []>} : vector<8x16xf32>, vector<16x1024xf32>, vector<8x1024xf32> -> vector<8x1024xf32>
    %c0_3 = arith.constant 0 : index
    %c0_4 = arith.constant 0 : index
    %3 = vector.load %arg3[%c0_3, %c0_4] : memref<1x1024xf32, #tpu.memory_space<vmem>>, vector<1x1024xf32>
    %4 = vector.broadcast %3 : vector<1x1024xf32> to vector<8x1024xf32>
    %5 = arith.addf %2, %4 : vector<8x1024xf32>
    %cst_5 = arith.constant 0.000000e+00 : f32
    %6 = vector.broadcast %cst_5 : f32 to vector<8x1024xf32>
    %7 = arith.cmpf oge, %5, %6 : vector<8x1024xf32>
    %cst_6 = arith.constant 1.000000e-01 : f32
    %8 = vector.broadcast %cst_6 : f32 to vector<8x1024xf32>
    %9 = arith.mulf %8, %5 : vector<8x1024xf32>
    %10 = arith.select %7, %5, %9 : vector<8x1024xi1>, vector<8x1024xf32>
    %cst_7 = arith.constant 0.000000e+00 : f32
    %11 = vector.broadcast %cst_7 : f32 to vector<8x128xf32>
    %c0_8 = arith.constant 0 : index
    %c0_9 = arith.constant 0 : index
    %12 = vector.load %arg10[%c0_8, %c0_9] : memref<80x128xf32, #tpu.memory_space<vmem>>, vector<8x128xf32>
    tpu.vector_store %arg10[%c0_8, %c0_9], %11 {strides = array<i32>} : memref<80x128xf32, #tpu.memory_space<vmem>>, vector<8x128xf32>,
    %cst_10 = arith.constant 0.000000e+00 : f32
    %13 = vector.broadcast %cst_10 : f32 to vector<8x128xf32>
    %c72 = arith.constant 72 : index
    %c0_11 = arith.constant 0 : index
    %14 = vector.load %arg10[%c72, %c0_11] : memref<80x128xf32, #tpu.memory_space<vmem>>, vector<8x128xf32>
    tpu.vector_store %arg10[%c72, %c0_11], %13 {strides = array<i32>} : memref<80x128xf32, #tpu.memory_space<vmem>>, vector<8x128xf32>,
    %15 = vector.extract_strided_slice %10 {offsets = [0, 0], sizes = [8, 128], strides = [1, 1]} : vector<8x1024xf32> to vector<8x128xf32>
    %c8 = arith.constant 8 : index
    %c0_12 = arith.constant 0 : index
    %16 = vector.load %arg10[%c8, %c0_12] : memref<80x128xf32, #tpu.memory_space<vmem>>, vector<8x128xf32>
    tpu.vector_store %arg10[%c8, %c0_12], %15 {strides = array<i32>} : memref<80x128xf32, #tpu.memory_space<vmem>>, vector<8x128xf32>,
    %17 = vector.extract_strided_slice %10 {offsets = [0, 128], sizes = [8, 128], strides = [1, 1]} : vector<8x1024xf32> to vector<8x128xf32>
    %c16 = arith.constant 16 : index
    %c0_13 = arith.constant 0 : index
    %18 = vector.load %arg10[%c16, %c0_13] : memref<80x128xf32, #tpu.memory_space<vmem>>, vector<8x128xf32>
    tpu.vector_store %arg10[%c16, %c0_13], %17 {strides = array<i32>} : memref<80x128xf32, #tpu.memory_space<vmem>>, vector<8x128xf32>,
    %19 = vector.extract_strided_slice %10 {offsets = [0, 256], sizes = [8, 128], strides = [1, 1]} : vector<8x1024xf32> to vector<8x128xf32>
    %c24 = arith.constant 24 : index
    %c0_14 = arith.constant 0 : index
    %20 = vector.load %arg10[%c24, %c0_14] : memref<80x128xf32, #tpu.memory_space<vmem>>, vector<8x128xf32>
    tpu.vector_store %arg10[%c24, %c0_14], %19 {strides = array<i32>} : memref<80x128xf32, #tpu.memory_space<vmem>>, vector<8x128xf32>,
    %21 = vector.extract_strided_slice %10 {offsets = [0, 384], sizes = [8, 128], strides = [1, 1]} : vector<8x1024xf32> to vector<8x128xf32>
    %c32 = arith.constant 32 : index
    %c0_15 = arith.constant 0 : index
    %22 = vector.load %arg10[%c32, %c0_15] : memref<80x128xf32, #tpu.memory_space<vmem>>, vector<8x128xf32>
    tpu.vector_store %arg10[%c32, %c0_15], %21 {strides = array<i32>} : memref<80x128xf32, #tpu.memory_space<vmem>>, vector<8x128xf32>,
    %23 = vector.extract_strided_slice %10 {offsets = [0, 512], sizes = [8, 128], strides = [1, 1]} : vector<8x1024xf32> to vector<8x128xf32>
    %c40 = arith.constant 40 : index
    %c0_16 = arith.constant 0 : index
    %24 = vector.load %arg10[%c40, %c0_16] : memref<80x128xf32, #tpu.memory_space<vmem>>, vector<8x128xf32>
    tpu.vector_store %arg10[%c40, %c0_16], %23 {strides = array<i32>} : memref<80x128xf32, #tpu.memory_space<vmem>>, vector<8x128xf32>,
    %25 = vector.extract_strided_slice %10 {offsets = [0, 640], sizes = [8, 128], strides = [1, 1]} : vector<8x1024xf32> to vector<8x128xf32>
    %c48 = arith.constant 48 : index
    %c0_17 = arith.constant 0 : index
    %26 = vector.load %arg10[%c48, %c0_17] : memref<80x128xf32, #tpu.memory_space<vmem>>, vector<8x128xf32>
    tpu.vector_store %arg10[%c48, %c0_17], %25 {strides = array<i32>} : memref<80x128xf32, #tpu.memory_space<vmem>>, vector<8x128xf32>,
    %27 = vector.extract_strided_slice %10 {offsets = [0, 768], sizes = [8, 128], strides = [1, 1]} : vector<8x1024xf32> to vector<8x128xf32>
    %c56 = arith.constant 56 : index
    %c0_18 = arith.constant 0 : index
    %28 = vector.load %arg10[%c56, %c0_18] : memref<80x128xf32, #tpu.memory_space<vmem>>, vector<8x128xf32>
    tpu.vector_store %arg10[%c56, %c0_18], %27 {strides = array<i32>} : memref<80x128xf32, #tpu.memory_space<vmem>>, vector<8x128xf32>,
    %29 = vector.extract_strided_slice %10 {offsets = [0, 896], sizes = [8, 128], strides = [1, 1]} : vector<8x1024xf32> to vector<8x128xf32>
    %c64 = arith.constant 64 : index
    %c0_19 = arith.constant 0 : index
    %30 = vector.load %arg10[%c64, %c0_19] : memref<80x128xf32, #tpu.memory_space<vmem>>, vector<8x128xf32>
    tpu.vector_store %arg10[%c64, %c0_19], %29 {strides = array<i32>} : memref<80x128xf32, #tpu.memory_space<vmem>>, vector<8x128xf32>,
    %c0_20 = arith.constant 0 : index
    %c0_21 = arith.constant 0 : index
    %31 = vector.load %arg10[%c0_20, %c0_21] : memref<80x128xf32, #tpu.memory_space<vmem>>, vector<64x128xf32>
    %c8_22 = arith.constant 8 : index
    %c0_23 = arith.constant 0 : index
    %32 = vector.load %arg10[%c8_22, %c0_23] : memref<80x128xf32, #tpu.memory_space<vmem>>, vector<64x128xf32>
    %c16_24 = arith.constant 16 : index
    %c0_25 = arith.constant 0 : index
    %33 = vector.load %arg10[%c16_24, %c0_25] : memref<80x128xf32, #tpu.memory_space<vmem>>, vector<64x128xf32>
    %34 = tpu.concatenate %31, %32, %33 in 1 : vector<64x128xf32>, vector<64x128xf32>, vector<64x128xf32> -> vector<64x384xf32>
    %c0_26 = arith.constant 0 : index
    %c0_27 = arith.constant 0 : index
    %35 = vector.load %arg4[%c0_26, %c0_27] : memref<384x128xf32, #tpu.memory_space<vmem>>, vector<384x128xf32>
    %cst_28 = arith.constant dense<0.000000e+00> : vector<64x128xf32>
    %36 = tpu.matmul %34, %35, %cst_28 {dimension_numbers = #tpu.dot_dimension_numbers<[1], [0], [0], [1], [0, 0, 1, 1], [], []>} : vector<64x384xf32>, vector<384x128xf32>, vector<64x128xf32> -> vector<64x128xf32>
    %c0_29 = arith.constant 0 : index
    %c0_30 = arith.constant 0 : index
    %37 = vector.load %arg5[%c0_29, %c0_30] : memref<1x128xf32, #tpu.memory_space<vmem>>, vector<1x128xf32>
    %38 = vector.broadcast %37 : vector<1x128xf32> to vector<64x128xf32>
    %39 = arith.addf %36, %38 : vector<64x128xf32>
    %cst_31 = arith.constant 0.000000e+00 : f32
    %40 = vector.broadcast %cst_31 : f32 to vector<64x128xf32>
    %41 = arith.cmpf oge, %39, %40 : vector<64x128xf32>
    %cst_32 = arith.constant 1.000000e-01 : f32
    %42 = vector.broadcast %cst_32 : f32 to vector<64x128xf32>
    %43 = arith.mulf %42, %39 : vector<64x128xf32>
    %44 = arith.select %41, %39, %43 : vector<64x128xi1>, vector<64x128xf32>
    %45 = vector.shape_cast %44 : vector<64x128xf32> to vector<8x1x8x128xf32>
    %46 = vector.shape_cast %45 : vector<8x1x8x128xf32> to vector<8x1x8x128xf32>
    %47 = vector.broadcast %46 : vector<8x1x8x128xf32> to vector<8x2x8x128xf32>
    %48 = vector.shape_cast %47 : vector<8x2x8x128xf32> to vector<128x128xf32>
    %c0_33 = arith.constant 0 : index
    %c0_34 = arith.constant 0 : index
    %49 = vector.load %arg11[%c0_33, %c0_34] : memref<128x128xf32, #tpu.memory_space<vmem>>, vector<128x128xf32>
    tpu.vector_store %arg11[%c0_33, %c0_34], %48 {strides = array<i32>} : memref<128x128xf32, #tpu.memory_space<vmem>>, vector<128x128xf32>,
    %c0_35 = arith.constant 0 : index
    %c0_36 = arith.constant 0 : index
    %50 = vector.load %arg11[%c0_35, %c0_36] : memref<128x128xf32, #tpu.memory_space<vmem>>, vector<112x128xf32>
    %c8_37 = arith.constant 8 : index
    %c0_38 = arith.constant 0 : index
    %51 = vector.load %arg11[%c8_37, %c0_38] : memref<128x128xf32, #tpu.memory_space<vmem>>, vector<112x128xf32>
    %c16_39 = arith.constant 16 : index
    %c0_40 = arith.constant 0 : index
    %52 = vector.load %arg11[%c16_39, %c0_40] : memref<128x128xf32, #tpu.memory_space<vmem>>, vector<112x128xf32>
    %53 = tpu.concatenate %50, %51, %52 in 1 : vector<112x128xf32>, vector<112x128xf32>, vector<112x128xf32> -> vector<112x384xf32>
    %c0_41 = arith.constant 0 : index
    %c0_42 = arith.constant 0 : index
    %54 = vector.load %arg6[%c0_41, %c0_42] : memref<384x128xf32, #tpu.memory_space<vmem>>, vector<384x128xf32>
    %cst_43 = arith.constant dense<0.000000e+00> : vector<112x128xf32>
    %55 = tpu.matmul %53, %54, %cst_43 {dimension_numbers = #tpu.dot_dimension_numbers<[1], [0], [0], [1], [0, 0, 1, 1], [], []>} : vector<112x384xf32>, vector<384x128xf32>, vector<112x128xf32> -> vector<112x128xf32>
    %c0_44 = arith.constant 0 : index
    %c0_45 = arith.constant 0 : index
    %56 = vector.load %arg7[%c0_44, %c0_45] : memref<1x128xf32, #tpu.memory_space<vmem>>, vector<1x128xf32>
    %57 = vector.broadcast %56 : vector<1x128xf32> to vector<112x128xf32>
    %58 = arith.addf %55, %57 : vector<112x128xf32>
    %cst_46 = arith.constant 0.000000e+00 : f32
    %59 = vector.broadcast %cst_46 : f32 to vector<112x128xf32>
    %60 = arith.cmpf oge, %58, %59 : vector<112x128xf32>
    %cst_47 = arith.constant 1.000000e-01 : f32
    %61 = vector.broadcast %cst_47 : f32 to vector<112x128xf32>
    %62 = arith.mulf %61, %58 : vector<112x128xf32>
    %63 = arith.select %60, %58, %62 : vector<112x128xi1>, vector<112x128xf32>
    %cst_48 = arith.constant 0.000000e+00 : f32
    %64 = vector.broadcast %cst_48 : f32 to vector<16x128xf32>
    %c0_49 = arith.constant 0 : index
    %c0_50 = arith.constant 0 : index
    %65 = vector.load %arg12[%c0_49, %c0_50] : memref<256x128xf32, #tpu.memory_space<vmem>>, vector<16x128xf32>
    tpu.vector_store %arg12[%c0_49, %c0_50], %64 {strides = array<i32>} : memref<256x128xf32, #tpu.memory_space<vmem>>, vector<16x128xf32>,
    %cst_51 = arith.constant 0.000000e+00 : f32
    %66 = vector.broadcast %cst_51 : f32 to vector<16x128xf32>
    %c240 = arith.constant 240 : index
    %c0_52 = arith.constant 0 : index
    %67 = vector.load %arg12[%c240, %c0_52] : memref<256x128xf32, #tpu.memory_space<vmem>>, vector<16x128xf32>
    tpu.vector_store %arg12[%c240, %c0_52], %66 {strides = array<i32>} : memref<256x128xf32, #tpu.memory_space<vmem>>, vector<16x128xf32>,
    %68 = vector.shape_cast %63 : vector<112x128xf32> to vector<14x1x8x128xf32>
    %69 = vector.shape_cast %68 : vector<14x1x8x128xf32> to vector<14x1x8x128xf32>
    %70 = vector.broadcast %69 : vector<14x1x8x128xf32> to vector<14x2x8x128xf32>
    %71 = vector.shape_cast %70 : vector<14x2x8x128xf32> to vector<224x128xf32>
    %c16_53 = arith.constant 16 : index
    %c0_54 = arith.constant 0 : index
    %72 = vector.load %arg12[%c16_53, %c0_54] : memref<256x128xf32, #tpu.memory_space<vmem>>, vector<224x128xf32>
    tpu.vector_store %arg12[%c16_53, %c0_54], %71 {strides = array<i32>} : memref<256x128xf32, #tpu.memory_space<vmem>>, vector<224x128xf32>,
    %c0_55 = arith.constant 0 : index
    %c0_56 = arith.constant 0 : index
    %73 = vector.load %arg12[%c0_55, %c0_56] : memref<256x128xf32, #tpu.memory_space<vmem>>, vector<224x128xf32>
    %c8_57 = arith.constant 8 : index
    %c0_58 = arith.constant 0 : index
    %74 = vector.load %arg12[%c8_57, %c0_58] : memref<256x128xf32, #tpu.memory_space<vmem>>, vector<224x128xf32>
    %c16_59 = arith.constant 16 : index
    %c0_60 = arith.constant 0 : index
    %75 = vector.load %arg12[%c16_59, %c0_60] : memref<256x128xf32, #tpu.memory_space<vmem>>, vector<224x128xf32>
    %c24_61 = arith.constant 24 : index
    %c0_62 = arith.constant 0 : index
    %76 = vector.load %arg12[%c24_61, %c0_62] : memref<256x128xf32, #tpu.memory_space<vmem>>, vector<224x128xf32>
    %c32_63 = arith.constant 32 : index
    %c0_64 = arith.constant 0 : index
    %77 = vector.load %arg12[%c32_63, %c0_64] : memref<256x128xf32, #tpu.memory_space<vmem>>, vector<224x128xf32>
    %78 = tpu.concatenate %73, %74, %75, %76, %77 in 1 : vector<224x128xf32>, vector<224x128xf32>, vector<224x128xf32>, vector<224x128xf32>, vector<224x128xf32> -> vector<224x640xf32>
    %c0_65 = arith.constant 0 : index
    %c0_66 = arith.constant 0 : index
    %79 = vector.load %arg8[%c0_65, %c0_66] : memref<640x28xf32, #tpu.memory_space<vmem>>, vector<640x28xf32>
    %cst_67 = arith.constant dense<0.000000e+00> : vector<224x28xf32>
    %80 = tpu.matmul %78, %79, %cst_67 {dimension_numbers = #tpu.dot_dimension_numbers<[1], [0], [0], [1], [0, 0, 1, 1], [], []>} : vector<224x640xf32>, vector<640x28xf32>, vector<224x28xf32> -> vector<224x28xf32>
    %cst_68 = arith.constant 0.000000e+00 : f32
    %81 = vector.broadcast %cst_68 : f32 to vector<224x28xf32>
    %82 = arith.subf %81, %80 : vector<224x28xf32>
    %83 = math.exp %82 : vector<224x28xf32>
    %cst_69 = arith.constant 1.000000e+00 : f32
    %84 = vector.broadcast %cst_69 : f32 to vector<224x28xf32>
    %85 = arith.addf %84, %83 : vector<224x28xf32>
    %86 = tpu.reciprocal %85 : vector<224x28xf32> -> vector<224x28xf32>
    %c0_70 = arith.constant 0 : index
    %c0_71 = arith.constant 0 : index
    %c0_72 = arith.constant 0 : index
    %87 = vector.load %arg9[%c0_70, %c0_71, %c0_72] : memref<1x224x28xf32, #tpu.memory_space<vmem>>, vector<1x224x28xf32>
    %88 = vector.shape_cast %87 : vector<1x224x28xf32> to vector<224x28xf32>
    %89 = vector.shape_cast %86 : vector<224x28xf32> to vector<1x224x28xf32>
    tpu.vector_store %arg9[%c0_70, %c0_71, %c0_72], %89 {strides = array<i32>} : memref<1x224x28xf32, #tpu.memory_space<vmem>>, vector<1x224x28xf32>,
    return
  }
  func.func @transform_0(%arg0: i32) -> (i32, i32) {
    %c0_i32 = arith.constant 0 : i32
    %c0_i32_0 = arith.constant 0 : i32
    return %arg0, %c0_i32 : i32, i32
  }
  func.func @transform_1(%arg0: i32) -> (i32, i32) {
    %c0_i32 = arith.constant 0 : i32
    %c0_i32_0 = arith.constant 0 : i32
    %c0_i32_1 = arith.constant 0 : i32
    return %c0_i32, %c0_i32_0 : i32, i32
  }
  func.func @transform_2(%arg0: i32) -> (i32, i32) {
    %c0_i32 = arith.constant 0 : i32
    %c0_i32_0 = arith.constant 0 : i32
    %c0_i32_1 = arith.constant 0 : i32
    return %c0_i32, %c0_i32_0 : i32, i32
  }
  func.func @transform_3(%arg0: i32) -> (i32, i32) {
    %c0_i32 = arith.constant 0 : i32
    %c0_i32_0 = arith.constant 0 : i32
    %c0_i32_1 = arith.constant 0 : i32
    return %c0_i32, %c0_i32_0 : i32, i32
  }
  func.func @transform_4(%arg0: i32) -> (i32, i32) {
    %c0_i32 = arith.constant 0 : i32
    %c0_i32_0 = arith.constant 0 : i32
    %c0_i32_1 = arith.constant 0 : i32
    return %c0_i32, %c0_i32_0 : i32, i32
  }
  func.func @transform_5(%arg0: i32) -> (i32, i32) {
    %c0_i32 = arith.constant 0 : i32
    %c0_i32_0 = arith.constant 0 : i32
    %c0_i32_1 = arith.constant 0 : i32
    return %c0_i32, %c0_i32_0 : i32, i32
  }
  func.func @transform_6(%arg0: i32) -> (i32, i32) {
    %c0_i32 = arith.constant 0 : i32
    %c0_i32_0 = arith.constant 0 : i32
    %c0_i32_1 = arith.constant 0 : i32
    return %c0_i32, %c0_i32_0 : i32, i32
  }
  func.func @transform_7(%arg0: i32) -> (i32, i32) {
    %c0_i32 = arith.constant 0 : i32
    %c0_i32_0 = arith.constant 0 : i32
    %c0_i32_1 = arith.constant 0 : i32
    return %c0_i32, %c0_i32_0 : i32, i32
  }
  func.func @transform_8(%arg0: i32) -> (i32, i32, i32) {
    %c0_i32 = arith.constant 0 : i32
    %c0_i32_0 = arith.constant 0 : i32
    %c0_i32_1 = arith.constant 0 : i32
    return %arg0, %c0_i32, %c0_i32_0 : i32, i32, i32
  }
}

</mosaic_0001>

<bundles_post_ra>
// kernel: _generator_pallas.1
= control target key start
LH: loop header
LB: loop body
LE: loop exit
PB: predicated region body
PF: predicated region fallthrough
CT: control target
= control target key end

     0   :  { %13 = vsyncpa [#allocation6], 0  ;;  %s3109_s27 = smov 0   ;;  %s4232_s0 = inlined_call_operand.vmem [shape: f32[16,16], index: 0, kind: input, shape index: {}]   ;;  %s4233_s1 = inlined_call_operand.hbm [shape: f32[16,1024], index: 1, kind: input, shape index: {}]   ;;  %s4234_s2 = inlined_call_operand.vmem [shape: f32[1,1024], index: 2, kind: input, shape index: {}]   ;;  %s4235_s3 = inlined_call_operand.vmem [shape: f32[384,128], index: 3, kind: input, shape index: {}]   ;;  %s4236_s4 = inlined_call_operand.vmem [shape: f32[1,128], index: 4, kind: input, shape index: {}]   ;;  %s4237_s5 = inlined_call_operand.vmem [shape: f32[384,128], index: 5, kind: input, shape index: {}]   ;;  %s4238_s6 = inlined_call_operand.vmem [shape: f32[1,128], index: 6, kind: input, shape index: {}]   ;;  %s4239_s7 = inlined_call_operand.vmem [shape: f32[640,28], index: 7, kind: input, shape index: {}]   ;;  %s4240_s8 = inlined_call_operand.vmem [shape: f32[2,224,28], index: 8, kind: output, shape index: {}]  }
   0x1 LB: > { %s3115_s28 = sadd.s32 4294967295, %s3058_s27   ;;  %p2441_p0 = scmp.ge.s32.totalorder %s3058_s27, 1  ;;  %s3058_s27 = sphi %s3109_s27, %s19_s27  }
   0x2   : > { %p223_p1 = scmp.lt.s32.totalorder %s3058_s27, 3  ;;  %s3060_s29 = smov [#allocation5]  }
   0x3   : > { %s235_s30 = sshll.u32 %s3060_s29, 4  ;;  %p2896_p3 = scmp.eq.s32.totalorder %s3115_s28, 0  ;;  %s236_s30 = int_to_ptr.vmem [resolvable:$true] %s235_s30 }
   0x4   : > { %p3119_p2 = pnand %p2441_p0, %p223_p1  ;;  %s3033_s10 = scalar_lea.vmem %s236_s30, 2048 }
   0x5   : > { %p3034_p7 = scmp.ne.s32.totalorder %s236_s30, %s3033_s10  ;;  %p3041_p10 = scmp.lt.s32.totalorder %s236_s30, %s236_s30 }
   0x6   : > { %p2892_p4 = pneg %p3119_p2  ;;  %p3042_p11 = scmp.lt.s32.totalorder %s3033_s10, %s3033_s10 }
   0x8   : > { %p2893_p5 = pnand %p2896_p3, %p2892_p4  ;;  %p3043_p12 = por %p3042_p11, %p3041_p10 }
   0xa   : > { %p3024_p6 = pneg %p2893_p5 }
   0xc   : > { %p3036_p8 = pnand %p3034_p7, %p3024_p6 }
   0xe   : > { %p3037_p9 = pneg %p3036_p8 }
  0x10   : > { %p3044_p13 = pnand %p3043_p12, %p3037_p9 }
  0x12   : > { %3047 = shalt.err (!%p3044_p13)
}
  0x13   : > { %s3061_s11 = smov 1024   ;;  %s3062_s12 = smov 64  }
  0x14   : > { %2895 = dma.hbm_to_vmem [thread:$0]  (!%p2893_p5), %s4233_s1, 2048, %s236_s30, [#allocation6], %s3061_s11, %s3061_s11, %s3062_s12  }
  0x15   : > { %276 = sbr.rel (%p3119_p2) target bundleno = 1026 (0x402), region = 52 }
  0x1a   : > { %3053 = dma.done.wait (%p2896_p3), [#allocation6], 2048  }
  0x1b   : > { %3055 = vsyncadd (%p2896_p3), [#allocation6], 4294965248  ;;  %p309_p0 = scmp.lt.s32.totalorder %s3115_s28, 1  ;;  %v3063_v0 = vmov 0.0   ;;  %v328_v1 = vld [vmem:[#allocation5 + $0x48] sm:$0xff]  ;;  %v327_v2 = vld [vmem:[#allocation5 + $0x40] sm:$0xff] }
  0x1c   : > { %445 = vmatprep.mubr.f32.mxu0 %v3063_v0  ;;  %516 = vmatprep.mubr.f32.mxu1 %v3063_v0  ;;  %v330_v3 = vld [vmem:[#allocation5 + $0x58] sm:$0xff]  ;;  %v320_v4 = vld [vmem:[#allocation5 + $0x8] sm:$0xff]  ;;  %v329_v5 = vld [vmem:[#allocation5 + $0x50] sm:$0xff]  ;;  %vm377_vm0 = vcmask 130048  }
  0x1d   : > { %s4243_s28 = smov (!%p309_p0, %s3115_s28), 1  ;;  %409 = vmatprep.subr.mxu0 %v328_v1  ;;  %480 = vmatprep.subr.mxu1 %v330_v3  ;;  %v319_v6 = vld [vmem:[#allocation5] sm:$0xff]  ;;  %v322_v7 = vld [vmem:[#allocation5 + $0x18] sm:$0xff]  ;;  %v321_v9 = vld [vmem:[#allocation5 + $0x10] sm:$0xff] }
  0x1e   : > { %s2446_s15 = sshll.u32 %s4243_s28, 3  ;;  %410 = vmatpush1.msra.mxu0 %v327_v2  ;;  %481 = vmatpush1.msra.mxu1 %v329_v5  ;;  %v332_v10 = vld [vmem:[#allocation5 + $0x68] sm:$0xff]  ;;  %v331_v11 = vld [vmem:[#allocation5 + $0x60] sm:$0xff]  ;;  %v334_v12 = vld [vmem:[#allocation5 + $0x78] sm:$0xff]  ;;  %v337_v5 = vlaneseq  ;;  %s2887_s17 = smul.u32 224, %s4243_s28 }
  0x1f   : > { %s312_s18 = scalar_lea.vmem %s4232_s0, %s2446_s15  ;;  %411 = vmatprep.subr.mxu0 %v320_v4  ;;  %482 = vmatprep.subr.mxu1 %v322_v7  ;;  %v324_v13 = vld [vmem:[#allocation5 + $0x28] sm:$0xff]  ;;  %v333_v14 = vld [vmem:[#allocation5 + $0x70] sm:$0xff]  ;;  %v323_v15 = vld [vmem:[#allocation5 + $0x20] sm:$0xff] }
  0x20   : > { %v318_v8 = vld [vmem:[%s312_s18] sm:$0xff]  ;;  %412 = vmatpush1.msra.mxu0 %v319_v6  ;;  %483 = vmatpush1.msra.mxu1 %v321_v9  ;;  %v326_v16 = vld [vmem:[#allocation5 + $0x38] sm:$0xff]  ;;  %v325_v17 = vld [vmem:[#allocation5 + $0x30] sm:$0xff]  ;;  %v338_v6 = vshrl.u32 %v337_v5, 7  ;;  %s4167_s19 = scalar_lea.vmem %s4240_s8, %s2887_s17 }
  0x21   : > { %2448 = vmatmul.mubr.msk.f32.vlgmr.msra.gmra.mxu0 %vm377_vm0, %v318_v8  ;;  %2449 = vmatmul.mubr.msk.f32.vlgmr.msra.gmra.mxu1 %vm377_vm0, %v318_v8  ;;  %v747_v18 = vld [vmem:[%s4235_s3 + $0xf8] sm:$0xff]  ;;  %v746_v20 = vld [vmem:[%s4235_s3 + $0xf0] sm:$0xff]  ;;  %v745_v23 = vld [vmem:[%s4235_s3 + $0xe8] sm:$0xff] }
  0x22   : > { %551 = vmatprep.subr.mxu0 %v332_v10  ;;  %587 = vmatprep.mubr.f32.mxu0 %v3063_v0  ;;  %v731_v19 = vld [vmem:[%s4235_s3 + $0x78] sm:$0xff]  ;;  %v730_v22 = vld [vmem:[%s4235_s3 + $0x70] sm:$0xff]  ;;  %v729_v25 = vld [vmem:[%s4235_s3 + $0x68] sm:$0xff]  ;;  %v339_v7 = vsub.s32 0, %v338_v6  ;;  %v343_v10 = vsub.s32 1, %v338_v6 }
  0x23   : > { %552 = vmatpush1.msra.mxu0 %v331_v11  ;;  %622 = vmatprep.subr.mxu1 %v334_v12  ;;  %v763_v21 = vld [vmem:[%s4235_s3 + $0x178] sm:$0xff]  ;;  %v762_v24 = vld [vmem:[%s4235_s3 + $0x170] sm:$0xff]  ;;  %v744_v26 = vld [vmem:[%s4235_s3 + $0xe0] sm:$0xff]  ;;  %v351_v11 = vsub.s32 3, %v338_v6 }
  0x24   : > { %553 = vmatprep.subr.mxu0 %v324_v13  ;;  %623 = vmatpush1.msra.mxu1 %v333_v14  ;;  %v761_v27 = vld [vmem:[%s4235_s3 + $0x168] sm:$0xff]  ;;  %v728_v28 = vld [vmem:[%s4235_s3 + $0x60] sm:$0xff]  ;;  %v743_v29 = vld [vmem:[%s4235_s3 + $0xd8] sm:$0xff]  ;;  %v355_v14 = vsub.s32 4, %v338_v6 }
  0x25   : > { %554 = vmatpush1.msra.mxu0 %v323_v15  ;;  %624 = vmatprep.subr.mxu1 %v326_v16  ;;  %v760_v30 = vld [vmem:[%s4235_s3 + $0x160] sm:$0xff]  ;;  %v727_v31 = vld [vmem:[%s4235_s3 + $0x58] sm:$0xff]  ;;  %v742_v32 = vld [vmem:[%s4235_s3 + $0xd0] sm:$0xff] }
  0x26   : > { %2450 = vmatmul.mubr.msk.f32.vlgmr.msra.gmra.mxu0 %vm377_vm0, %v318_v8  ;;  %625 = vmatpush1.msra.mxu1 %v325_v17  ;;  %v759_v33 = vld [vmem:[%s4235_s3 + $0x158] sm:$0xff]  ;;  %v726_v34 = vld [vmem:[%s4235_s3 + $0x50] sm:$0xff]  ;;  %v741_v35 = vld [vmem:[%s4235_s3 + $0xc8] sm:$0xff] }
  0x27   : > { %658 = vmatprep.mubr.f32.mxu1 %v3063_v0  ;;  %2456 = vmatprep.subr.mxu0 %v747_v18  ;;  %v758_v36 = vld [vmem:[%s4235_s3 + $0x150] sm:$0xff]  ;;  %v725_v37 = vld [vmem:[%s4235_s3 + $0x48] sm:$0xff]  ;;  %v740_v38 = vld [vmem:[%s4235_s3 + $0xc0] sm:$0xff] }
  0x28   : > { %2451 = vmatmul.mubr.msk.f32.vlgmr.msra.gmra.mxu1 %vm377_vm0, %v318_v8  ;;  %2457 = vmatpush3.msra.mxu0 %v731_v19  ;;  %v757_v39 = vld [vmem:[%s4235_s3 + $0x148] sm:$0xff]  ;;  %v724_v40 = vld [vmem:[%s4235_s3 + $0x40] sm:$0xff]  ;;  %v739_v41 = vld [vmem:[%s4235_s3 + $0xb8] sm:$0xff]  ;;  %v347_v8 = vsub.s32 2, %v338_v6  ;;  %v359_v19 = vsub.s32 5, %v338_v6 }
  0x29   : > { %2458 = vmatprep.subr.mxu0 %v746_v20  ;;  %2684 = vmatprep.subr.mxu1 %v763_v21  ;;  %v756_v42 = vld [vmem:[%s4235_s3 + $0x140] sm:$0xff]  ;;  %v723_v43 = vld [vmem:[%s4235_s3 + $0x38] sm:$0xff]  ;;  %v738_v44 = vld [vmem:[%s4235_s3 + $0xb0] sm:$0xff]  ;;  %v363_v20 = vsub.s32 6, %v338_v6 }
  0x2a   : > { %2459 = vmatpush3.msra.mxu0 %v730_v22  ;;  %2685 = vmatpush3.msra.mxu1 %v763_v21  ;;  %v755_v45 = vld [vmem:[%s4235_s3 + $0x138] sm:$0xff]  ;;  %v722_v46 = vld [vmem:[%s4235_s3 + $0x30] sm:$0xff]  ;;  %v737_v47 = vld [vmem:[%s4235_s3 + $0xa8] sm:$0xff] }
  0x2b   : > { %2460 = vmatprep.subr.mxu0 %v745_v23  ;;  %2686 = vmatprep.subr.mxu1 %v762_v24  ;;  %v754_v48 = vld [vmem:[%s4235_s3 + $0x130] sm:$0xff]  ;;  %v721_v49 = vld [vmem:[%s4235_s3 + $0x28] sm:$0xff]  ;;  %v736_v50 = vld [vmem:[%s4235_s3 + $0xa0] sm:$0xff]  ;;  %v367_v23 = vsub.s32 7, %v338_v6 }
  0x2c   : > { %2461 = vmatpush3.msra.mxu0 %v729_v25  ;;  %2687 = vmatpush3.msra.mxu1 %v762_v24  ;;  %v753_v51 = vld [vmem:[%s4235_s3 + $0x128] sm:$0xff]  ;;  %v720_v52 = vld [vmem:[%s4235_s3 + $0x20] sm:$0xff]  ;;  %v735_v53 = vld [vmem:[%s4235_s3 + $0x98] sm:$0xff] }
  0x2d   : > { %2462 = vmatprep.subr.mxu0 %v744_v26  ;;  %2688 = vmatprep.subr.mxu1 %v761_v27  ;;  %v752_v54 = vld [vmem:[%s4235_s3 + $0x120] sm:$0xff]  ;;  %v719_v55 = vld [vmem:[%s4235_s3 + $0x18] sm:$0xff]  ;;  %v734_v56 = vld [vmem:[%s4235_s3 + $0x90] sm:$0xff] }
  0x2e   : > { %2463 = vmatpush3.msra.mxu0 %v728_v28  ;;  %2689 = vmatpush3.msra.mxu1 %v761_v27  ;;  %v751_v57 = vld [vmem:[%s4235_s3 + $0x118] sm:$0xff]  ;;  %v718_v58 = vld [vmem:[%s4235_s3 + $0x10] sm:$0xff]  ;;  %v733_v59 = vld [vmem:[%s4235_s3 + $0x88] sm:$0xff] }
  0x2f   : > { %2464 = vmatprep.subr.mxu0 %v743_v29  ;;  %2690 = vmatprep.subr.mxu1 %v760_v30  ;;  %v750_v60 = vld [vmem:[%s4235_s3 + $0x110] sm:$0xff]  ;;  %v717_v61 = vld [vmem:[%s4235_s3 + $0x8] sm:$0xff]  ;;  %v732_v62 = vld [vmem:[%s4235_s3 + $0x80] sm:$0xff] }
  0x30   : > { %2465 = vmatpush3.msra.mxu0 %v727_v31  ;;  %2691 = vmatpush3.msra.mxu1 %v760_v30  ;;  %v749_v63 = vld [vmem:[%s4235_s3 + $0x108] sm:$0xff]  ;;  %v716_v1 = vld [vmem:[%s4235_s3] sm:$0xff]  ;;  %v1081_v3 = vld [vmem:[%s4237_s5 + $0xf8] sm:$0xff] }
  0x31   : > { %2466 = vmatprep.subr.mxu0 %v742_v32  ;;  %2692 = vmatprep.subr.mxu1 %v759_v33  ;;  %v748_v2 = vld [vmem:[%s4235_s3 + $0x100] sm:$0xff]  ;;  %v3303_v4 = vld [vmem:[%s4237_s5 + $0x178] sm:$0xff]  ;;  %v1060_v6 = vld [vmem:[%s4237_s5 + $0x50] sm:$0xff] }
  0x32   : > { %2467 = vmatpush3.msra.mxu0 %v726_v34  ;;  %2693 = vmatpush3.msra.mxu1 %v759_v33  ;;  %v335_v9 = vld [vmem:[%s4234_s2] sm:$0xff] }
  0x33   : > { %2468 = vmatprep.subr.mxu0 %v741_v35  ;;  %2694 = vmatprep.subr.mxu1 %v758_v36  ;;  %v340_v12 = vrot.slane %v335_v9, %v339_v7  ;;  %v348_v13 = vrot.slane %v335_v9, %v347_v8  ;;  %v344_v15 = vrot.slane %v335_v9, %v343_v10  ;;  %v1094_v5 = vld [vmem:[%s4237_s5 + $0x160] sm:$0xff]  ;;  %v1075_v7 = vld [vmem:[%s4237_s5 + $0xc8] sm:$0xff] }
  0x34   : > { %2469 = vmatpush3.msra.mxu0 %v725_v37  ;;  %2695 = vmatpush3.msra.mxu1 %v758_v36  ;;  %v352_v18 = vrot.slane %v335_v9, %v351_v11  ;;  %v356_v26 = vrot.slane %v335_v9, %v355_v14  ;;  %v360_v31 = vrot.slane %v335_v9, %v359_v19  ;;  %v1059_v8 = vld [vmem:[%s4237_s5 + $0x48] sm:$0xff]  ;;  %v1074_v10 = vld [vmem:[%s4237_s5 + $0xc0] sm:$0xff] }
  0x35   : > { %2470 = vmatprep.subr.mxu0 %v740_v38  ;;  %2696 = vmatprep.subr.mxu1 %v757_v39  ;;  %v364_v32 = vrot.slane %v335_v9, %v363_v20  ;;  %v368_v36 = vrot.slane %v335_v9, %v367_v23  ;;  %v1093_v9 = vld [vmem:[%s4237_s5 + $0x158] sm:$0xff]  ;;  %v1058_v11 = vld [vmem:[%s4237_s5 + $0x40] sm:$0xff]  ;;  %v1091_v14 = vld [vmem:[%s4237_s5 + $0x148] sm:$0xff] }
  0x36   : > { %2471 = vmatpush3.msra.mxu0 %v724_v40  ;;  %2697 = vmatpush3.msra.mxu1 %v757_v39  ;;  %v1065_v40 = vld [vmem:[%s4237_s5 + $0x78] sm:$0xff]  ;;  %v1071_v19 = vld [vmem:[%s4237_s5 + $0xa8] sm:$0xff]  ;;  %v1054_v23 = vld [vmem:[%s4237_s5 + $0x20] sm:$0xff] }
  0x37   : > { %2472 = vmatprep.subr.mxu0 %v739_v41  ;;  %2698 = vmatprep.subr.mxu1 %v756_v42  ;;  %v1055_v20 = vld [vmem:[%s4237_s5 + $0x28] sm:$0xff] }
  0x38   : > { %2473 = vmatpush3.msra.mxu0 %v723_v43  ;;  %2699 = vmatpush3.msra.mxu1 %v756_v42 }
  0x39   : > { %2474 = vmatprep.subr.mxu0 %v738_v44  ;;  %2700 = vmatprep.subr.mxu1 %v755_v45  ;;  %v1080_v44 = vld [vmem:[%s4237_s5 + $0xf0] sm:$0xff] }
  0x3a   : > { %2475 = vmatpush3.msra.mxu0 %v722_v46  ;;  %2701 = vmatpush3.msra.mxu1 %v755_v45 }
  0x3b   : > { %2476 = vmatprep.subr.mxu0 %v737_v47  ;;  %2702 = vmatprep.subr.mxu1 %v754_v48 }
  0x3c   : > { %2477 = vmatpush3.msra.mxu0 %v721_v49  ;;  %2703 = vmatpush3.msra.mxu1 %v754_v48 }
  0x3d   : > { %2478 = vmatprep.subr.mxu0 %v736_v50  ;;  %2704 = vmatprep.subr.mxu1 %v753_v51  ;;  %v1064_v50 = vld [vmem:[%s4237_s5 + $0x70] sm:$0xff] }
  0x3e   : > { %2479 = vmatpush3.msra.mxu0 %v720_v52  ;;  %2705 = vmatpush3.msra.mxu1 %v753_v51 }
  0x3f   : > { %2480 = vmatprep.subr.mxu0 %v735_v53  ;;  %2706 = vmatprep.subr.mxu1 %v752_v54 }
  0x40   : > { %2707 = vmatpush3.msra.mxu1 %v752_v54  ;;  %2481 = vmatpush3.msra.mxu0 %v719_v55  ;;  %v1079_v54 = vld [vmem:[%s4237_s5 + $0xe8] sm:$0xff] }
  0x41   : > { %2482 = vmatprep.subr.mxu0 %v734_v56  ;;  %2708 = vmatprep.subr.mxu1 %v751_v57  ;;  %v1063_v56 = vld [vmem:[%s4237_s5 + $0x68] sm:$0xff] }
  0x42   : > { %2483 = vmatpush3.msra.mxu0 %v718_v58  ;;  %2709 = vmatpush3.msra.mxu1 %v751_v57 }
  0x43   : > { %2484 = vmatprep.subr.mxu0 %v733_v59  ;;  %2710 = vmatprep.subr.mxu1 %v750_v60  ;;  %v1078_v59 = vld [vmem:[%s4237_s5 + $0xe0] sm:$0xff] }
  0x44   : > { %2485 = vmatpush3.msra.mxu0 %v717_v61  ;;  %2711 = vmatpush3.msra.mxu1 %v750_v60  ;;  %v1062_v60 = vld [vmem:[%s4237_s5 + $0x60] sm:$0xff] }
  0x45   : > { %2486 = vmatprep.subr.mxu0 %v732_v62  ;;  %2712 = vmatprep.subr.mxu1 %v749_v63  ;;  %v1096_v62 = vld [vmem:[%s4237_s5 + $0x170] sm:$0xff] }
  0x46   : > { %2487 = vmatpush3.msra.mxu0 %v716_v1  ;;  %2713 = vmatpush3.msra.mxu1 %v749_v63  ;;  %v1077_v1 = vld [vmem:[%s4237_s5 + $0xd8] sm:$0xff] }
  0x47   : > { %2714 = vmatprep.subr.mxu1 %v748_v2  ;;  %2536 = vmatprep.subr.mxu0 %v1081_v3  ;;  %v1095_v3 = vld [vmem:[%s4237_s5 + $0x168] sm:$0xff] }
  0x48   : > { %2715 = vmatpush3.msra.mxu1 %v748_v2  ;;  %v1061_v2 = vld [vmem:[%s4237_s5 + $0x58] sm:$0xff] }
  0x49   : > { %2728 = vmatprep.subr.mxu1 %v3303_v4 }
  0xe1   : > { %v447_v16 = vpop.f32.mrf.mxu0  ;;  %v518_v17 = vpop.f32.mrf.mxu1 }
  0xe2   : > { %v448_v21 = vadd.f32 %v447_v16, %v340_v12  ;;  %v519_v22 = vadd.f32 %v518_v17, %v348_v13  ;;  %v1092_v12 = vld [vmem:[%s4237_s5 + $0x150] sm:$0xff]  ;;  %v1073_v13 = vld [vmem:[%s4237_s5 + $0xb8] sm:$0xff] }
  0xe3   : > { %v449_v24 = vpop.f32.mrf.mxu0  ;;  %v520_v25 = vpop.f32.mrf.mxu1  ;;  %v1072_v16 = vld [vmem:[%s4237_s5 + $0xb0] sm:$0xff] }
  0xe4   : > { %v673_v27 = vmul.f32 0.1, %v448_v21  ;;  %vm667_vm1 = vcmp.ge.f32.partialorder %v519_v22, 0.0  ;;  %v675_v28 = vmul.f32 0.1, %v519_v22  ;;  %v450_v29 = vadd.f32 %v449_v24, %v344_v15  ;;  %v1057_v15 = vld [vmem:[%s4237_s5 + $0x38] sm:$0xff] }
  0xe5   : > { %v521_v30 = vadd.f32 %v520_v25, %v352_v18  ;;  %vm665_vm2 = vcmp.ge.f32.partialorder %v448_v21, 0.0  ;;  %v1056_v17 = vld [vmem:[%s4237_s5 + $0x30] sm:$0xff]  ;;  %v1090_v18 = vld [vmem:[%s4237_s5 + $0x140] sm:$0xff]  ;;  %v1069_v25 = vld [vmem:[%s4237_s5 + $0x98] sm:$0xff] }
  0xe6   : > { %v681_v33 = vsel %vm665_vm2, %v448_v21, %v673_v27  ;;  %vm666_vm3 = vcmp.ge.f32.partialorder %v450_v29, 0.0  ;;  %v674_v34 = vmul.f32 0.1, %v450_v29  ;;  %v589_v35 = vpop.f32.mrf.mxu0  ;;  %v683_v38 = vsel %vm667_vm1, %v519_v22, %v675_v28  ;;  %v1089_v21 = vld [vmem:[%s4237_s5 + $0x138] sm:$0xff]  ;;  %v1070_v22 = vld [vmem:[%s4237_s5 + $0xa0] sm:$0xff]  ;;  %v1088_v24 = vld [vmem:[%s4237_s5 + $0x130] sm:$0xff] }
  0xe7   : > { %v676_v37 = vmul.f32 0.1, %v521_v30  ;;  %835 = vmatprep.mubr.f32.mxu0 %v681_v33  ;;  %vm668_vm4 = vcmp.ge.f32.partialorder %v521_v30, 0.0  ;;  %v590_v39 = vadd.f32 %v589_v35, %v356_v26  ;;  %v1087_v26 = vld [vmem:[%s4237_s5 + $0x128] sm:$0xff]  ;;  %v1053_v27 = vld [vmem:[%s4237_s5 + $0x18] sm:$0xff]  ;;  %v1068_v28 = vld [vmem:[%s4237_s5 + $0x90] sm:$0xff] }
  0xe8   : > { %836 = vmatmul.mubr.f32.vlgmr.msra.gmra.mxu0 %v3063_v0  ;;  %v682_v41 = vsel %vm666_vm3, %v450_v29, %v674_v34  ;;  %v591_v42 = vpop.f32.mrf.mxu0  ;;  %v660_v43 = vpop.f32.mrf.mxu1  ;;  %v1086_v29 = vld [vmem:[%s4237_s5 + $0x120] sm:$0xff]  ;;  %v1084_v35 = vld [vmem:[%s4237_s5 + $0x110] sm:$0xff] }
  0xe9   : > { %840 = vmatprep.mubr.f32.mxu0 %v682_v41  ;;  %2716 = vmatprep.mubr.f32.mxu1 %v682_v41  ;;  %v684_v45 = vsel %vm668_vm4, %v521_v30, %v676_v37  ;;  %v677_v46 = vmul.f32 0.1, %v590_v39  ;;  %v592_v47 = vadd.f32 %v591_v42, %v360_v31  ;;  %vm669_vm5 = vcmp.ge.f32.partialorder %v590_v39, 0.0  ;;  %v1052_v30 = vld [vmem:[%s4237_s5 + $0x10] sm:$0xff]  ;;  %v1067_v31 = vld [vmem:[%s4237_s5 + $0x88] sm:$0xff]  ;;  %v1066_v34 = vld [vmem:[%s4237_s5 + $0x80] sm:$0xff] }
  0xea   : > { %2717 = vmatmul.mubr.f32.vlgmr.msra.gmra.mxu1 %v683_v38  ;;  %v661_v48 = vadd.f32 %v660_v43, %v364_v32  ;;  %v662_v49 = vpop.f32.mrf.mxu1  ;;  %2537 = vmatpush3.msra.mxu0 %v1065_v40  ;;  %v1085_v32 = vld [vmem:[%s4237_s5 + $0x118] sm:$0xff]  ;;  %v1083_v37 = vld [vmem:[%s4237_s5 + $0x108] sm:$0xff]  ;;  %v3455_v42 = vld [vmem:[%s4236_s4] ss:$0 sm:$0xff] }
  0xeb   : > { %2719 = vmatprep.mubr.f32.mxu1 %v684_v45  ;;  %v685_v51 = vsel %vm669_vm5, %v590_v39, %v677_v46  ;;  %vm670_vm6 = vcmp.ge.f32.partialorder %v592_v47, 0.0  ;;  %v678_v52 = vmul.f32 0.1, %v592_v47  ;;  %v663_v53 = vadd.f32 %v662_v49, %v368_v36  ;;  %2538 = vmatprep.subr.mxu0 %v1080_v44  ;;  %v1050_v36 = vld [vmem:[%s4237_s5] sm:$0xff] }
  0xec   : > { %841 = vmatmul.mubr.f32.gmra.mxu0 %v681_v33  ;;  %v679_v55 = vmul.f32 0.1, %v661_v48  ;;  %vm671_vm7 = vcmp.ge.f32.partialorder %v661_v48, 0.0  ;;  %2729 = vmatpush3.msra.mxu1 %v3303_v4  ;;  %v1076_v4 = vld [vmem:[%s4237_s5 + $0xd0] sm:$0xff]  ;;  %v1051_v33 = vld [vmem:[%s4237_s5 + $0x8] sm:$0xff] }
  0xed   : > { %845 = vmatprep.mubr.f32.mxu0 %v683_v38  ;;  %v686_v57 = vsel %vm670_vm6, %v592_v47, %v678_v52  ;;  %v680_v58 = vmul.f32 0.1, %v663_v53  ;;  %vm672_vm8 = vcmp.ge.f32.partialorder %v663_v53, 0.0  ;;  %2539 = vmatpush3.msra.mxu0 %v1064_v50 }
  0xee   : > { %2720 = vmatmul.mubr.f32.gmra.mxu1 %v685_v51  ;;  %2540 = vmatprep.subr.mxu0 %v1079_v54  ;;  %v687_v61 = vsel %vm671_vm7, %v661_v48, %v679_v55 }
  0xef   : > { %2722 = vmatprep.mubr.f32.mxu1 %v686_v57  ;;  %2541 = vmatpush3.msra.mxu0 %v1063_v56  ;;  %v688_v63 = vsel %vm672_vm8, %v663_v53, %v680_v58  ;;  %v1523_v58 = vld [vmem:[%s4239_s7 + $0x78] sm:$0xff] }
  0xf0   : > { %846 = vmatmul.mubr.f32.gmra.mxu0 %v682_v41  ;;  %2542 = vmatprep.subr.mxu0 %v1078_v59 }
  0xf1   : > { %850 = vmatprep.mubr.f32.mxu0 %v684_v45  ;;  %2543 = vmatpush3.msra.mxu0 %v1062_v60 }
  0xf2   : > { %2723 = vmatmul.mubr.f32.gmra.mxu1 %v687_v61  ;;  %2730 = vmatprep.subr.mxu1 %v1096_v62 }
  0xf3   : > { %2725 = vmatprep.mubr.f32.mxu1 %v688_v63  ;;  %2544 = vmatprep.subr.mxu0 %v1077_v1 }
  0xf4   : > { %851 = vmatmul.mubr.f32.gmra.mxu0 %v683_v38  ;;  %2731 = vmatpush3.msra.mxu1 %v1096_v62  ;;  %v1082_v38 = vld [vmem:[%s4237_s5 + $0x100] sm:$0xff] }
  0xf5   : > { %855 = vmatprep.mubr.f32.mxu0 %v685_v51  ;;  %2545 = vmatpush3.msra.mxu0 %v1061_v2 }
  0xf6   : > { %2726 = vmatmul.mubr.f32.gmra.mxu1 %v3063_v0  ;;  %2732 = vmatprep.subr.mxu1 %v1095_v3 }
  0xf7   : > { %2546 = vmatprep.subr.mxu0 %v1076_v4  ;;  %2733 = vmatpush3.msra.mxu1 %v1095_v3  ;;  %v1522_v4 = vld [vmem:[%s4239_s7 + $0x70] sm:$0xff] }
  0xf8   : > { %856 = vmatmul.mubr.f32.gmra.mxu0 %v684_v45  ;;  %2734 = vmatprep.subr.mxu1 %v1094_v5 }
  0xf9   : > { %860 = vmatprep.mubr.f32.mxu0 %v686_v57  ;;  %2547 = vmatpush3.msra.mxu0 %v1060_v6 }
  0xfa   : > { %2548 = vmatprep.subr.mxu0 %v1075_v7  ;;  %2735 = vmatpush3.msra.mxu1 %v1094_v5  ;;  %v1555_v7 = vld [vmem:[%s4239_s7 + $0x178] sm:$0xff] }
  0xfb   : > { %2549 = vmatpush3.msra.mxu0 %v1059_v8  ;;  %2736 = vmatprep.subr.mxu1 %v1093_v9 }
  0xfc   : > { %861 = vmatmul.mubr.f32.gmra.mxu0 %v685_v51  ;;  %2550 = vmatprep.subr.mxu0 %v1074_v10  ;;  %v1521_v10 = vld [vmem:[%s4239_s7 + $0x68] sm:$0xff] }
  0xfd   : > { %865 = vmatprep.mubr.f32.mxu0 %v687_v61  ;;  %2737 = vmatpush3.msra.mxu1 %v1093_v9 }
  0xfe   : > { %2551 = vmatpush3.msra.mxu0 %v1058_v11  ;;  %2738 = vmatprep.subr.mxu1 %v1092_v12 }
  0xff   : > { %2552 = vmatprep.subr.mxu0 %v1073_v13  ;;  %2739 = vmatpush3.msra.mxu1 %v1092_v12 }
 0x100   : > { %866 = vmatmul.mubr.f32.gmra.mxu0 %v686_v57  ;;  %2740 = vmatprep.subr.mxu1 %v1091_v14 }
 0x101   : > { %870 = vmatprep.mubr.f32.mxu0 %v688_v63  ;;  %2553 = vmatpush3.msra.mxu0 %v1057_v15 }
 0x102   : > { %2554 = vmatprep.subr.mxu0 %v1072_v16  ;;  %2741 = vmatpush3.msra.mxu1 %v1091_v14 }
 0x103   : > { %2555 = vmatpush3.msra.mxu0 %v1056_v17  ;;  %2742 = vmatprep.subr.mxu1 %v1090_v18  ;;  %v1554_v17 = vld [vmem:[%s4239_s7 + $0x170] sm:$0xff] }
 0x104   : > { %871 = vmatmul.mubr.f32.gmra.mxu0 %v687_v61  ;;  %2743 = vmatpush3.msra.mxu1 %v1090_v18 }
 0x105   : > { %2556 = vmatprep.subr.mxu0 %v1071_v19  ;;  %2744 = vmatprep.subr.mxu1 %v1089_v21 }
 0x106   : > { %2557 = vmatpush3.msra.mxu0 %v1055_v20  ;;  %2745 = vmatpush3.msra.mxu1 %v1089_v21  ;;  %v1520_v20 = vld [vmem:[%s4239_s7 + $0x60] sm:$0xff] }
 0x107   : > { %2558 = vmatprep.subr.mxu0 %v1070_v22  ;;  %2746 = vmatprep.subr.mxu1 %v1088_v24 }
 0x108   : > { %2559 = vmatpush3.msra.mxu0 %v1054_v23  ;;  %2747 = vmatpush3.msra.mxu1 %v1088_v24 }
 0x109   : > { %2560 = vmatprep.subr.mxu0 %v1069_v25  ;;  %2748 = vmatprep.subr.mxu1 %v1087_v26 }
 0x10a   : > { %2561 = vmatpush3.msra.mxu0 %v1053_v27  ;;  %2749 = vmatpush3.msra.mxu1 %v1087_v26  ;;  %v1553_v27 = vld [vmem:[%s4239_s7 + $0x168] sm:$0xff] }
 0x10b   : > { %2562 = vmatprep.subr.mxu0 %v1068_v28  ;;  %2750 = vmatprep.subr.mxu1 %v1086_v29 }
 0x10c   : > { %2563 = vmatpush3.msra.mxu0 %v1052_v30  ;;  %2751 = vmatpush3.msra.mxu1 %v1086_v29  ;;  %v1519_v30 = vld [vmem:[%s4239_s7 + $0x58] sm:$0xff] }
 0x10d   : > { %2564 = vmatprep.subr.mxu0 %v1067_v31  ;;  %2752 = vmatprep.subr.mxu1 %v1085_v32 }
 0x10e   : > { %2565 = vmatpush3.msra.mxu0 %v1051_v33  ;;  %2753 = vmatpush3.msra.mxu1 %v1085_v32 }
 0x10f   : > { %2566 = vmatprep.subr.mxu0 %v1066_v34  ;;  %2754 = vmatprep.subr.mxu1 %v1084_v35 }
 0x110   : > { %2567 = vmatpush3.msra.mxu0 %v1050_v36  ;;  %2755 = vmatpush3.msra.mxu1 %v1084_v35 }
 0x111   : > { %2756 = vmatprep.subr.mxu1 %v1083_v37  ;;  %1588 = vmatprep.subr.mxu0 %v3063_v0 }
 0x112   : > { %2757 = vmatpush3.msra.mxu1 %v1083_v37  ;;  %v1552_v37 = vld [vmem:[%s4239_s7 + $0x160] sm:$0xff] }
 0x113   : > { %2758 = vmatprep.subr.mxu1 %v1082_v38 }
 0x114   : > { %2759 = vmatpush3.msra.mxu1 %v1082_v38 }
 0x115   : > { %1793 = vmatprep.subr.mxu1 %v3063_v0 }
 0x1a8   : > { %v2488_v39 = vpop.f32.mrf.mxu0 }
 0x1aa   : > { %v2489_v40 = vpop.f32.mrf.mxu0  ;;  %v2718_v41 = vpop.f32.mrf.mxu1 }
 0x1ab   : > { %v2490_v43 = vadd.f32 %v2489_v40, %v2488_v39  ;;  %v1518_v40 = vld [vmem:[%s4239_s7 + $0x50] sm:$0xff] }
 0x1ac   : > { %v2491_v44 = vpop.f32.mrf.mxu0  ;;  %v942_v46 = vpop.f32.mrf.mxu1 }
 0x1ad   : > { %v838_v45 = vadd.f32 %v2490_v43, %v3455_v42 }
 0x1ae   : > { %v2492_v47 = vpop.f32.mrf.mxu0  ;;  %v2721_v51 = vpop.f32.mrf.mxu1 }
 0x1af   : > { %v943_v48 = vadd.f32 %v942_v46, %v838_v45  ;;  %v2493_v49 = vadd.f32 %v2492_v47, %v2491_v44  ;;  %v1551_v46 = vld [vmem:[%s4239_s7 + $0x158] sm:$0xff] }
 0x1b0   : > { %v2494_v50 = vpop.f32.mrf.mxu0  ;;  %v952_v60 = vpop.f32.mrf.mxu1 }
 0x1b1   : > { %v989_v52 = vmul.f32 0.1, %v943_v48  ;;  %v843_v53 = vadd.f32 %v2493_v49, %v3455_v42  ;;  %vm981_vm9 = vcmp.ge.f32.partialorder %v943_v48, 0.0  ;;  %v1517_v49 = vld [vmem:[%s4239_s7 + $0x48] sm:$0xff] }
 0x1b2   : > { %v2495_v54 = vpop.f32.mrf.mxu0  ;;  %v2724_v6 = vpop.f32.mrf.mxu1 }
 0x1b3   : > { %v948_v55 = vadd.f32 %v2718_v41, %v843_v53  ;;  %v2496_v56 = vadd.f32 %v2495_v54, %v2494_v50  ;;  %v997_v57 = vsel %vm981_vm9, %v943_v48, %v989_v52  ;;  %v1516_v53 = vld [vmem:[%s4239_s7 + $0x40] sm:$0xff] }
 0x1b4   : > { %v2497_v59 = vpop.f32.mrf.mxu0  ;;  %1169 = vmatprep.mubr.f32.mxu0 %v997_v57  ;;  %v962_v16 = vpop.f32.mrf.mxu1 }
 0x1b5   : > { %vm982_vm10 = vcmp.ge.f32.partialorder %v948_v55, 0.0  ;;  %v990_v61 = vmul.f32 0.1, %v948_v55  ;;  %1170 = vmatmul.mubr.f32.vlgmr.msra.gmra.mxu0 %v997_v57  ;;  %v848_v62 = vadd.f32 %v2496_v56, %v3455_v42  ;;  %v1515_v56 = vld [vmem:[%s4239_s7 + $0x38] sm:$0xff] }
 0x1b6   : > { %v2498_v63 = vpop.f32.mrf.mxu0  ;;  %1589 = vmatpush1.msra.mxu0 %v1523_v58  ;;  %v2727_v26 = vpop.f32.mrf.mxu1  ;;  %v1514_v58 = vld [vmem:[%s4239_s7 + $0x30] sm:$0xff] }
 0x1b7   : > { %v2499_v1 = vadd.f32 %v2498_v63, %v2497_v59  ;;  %v953_v2 = vadd.f32 %v952_v60, %v848_v62  ;;  %v998_v3 = vsel %vm982_vm10, %v948_v55, %v990_v61  ;;  %1590 = vmatprep.subr.mxu0 %v3063_v0  ;;  %v1549_v55 = vld [vmem:[%s4239_s7 + $0x148] sm:$0xff]  ;;  %v1547_v59 = vld [vmem:[%s4239_s7 + $0x138] sm:$0xff]  ;;  %v1546_v61 = vld [vmem:[%s4239_s7 + $0x130] sm:$0xff] }
 0x1b8   : > { %v2500_v5 = vpop.f32.mrf.mxu0  ;;  %1174 = vmatprep.mubr.f32.mxu0 %v998_v3  ;;  %2760 = vmatprep.mubr.f32.mxu1 %v998_v3  ;;  %v972_v35 = vpop.f32.mrf.mxu1  ;;  %v1513_v60 = vld [vmem:[%s4239_s7 + $0x28] sm:$0xff]  ;;  %v1512_v62 = vld [vmem:[%s4239_s7 + $0x20] sm:$0xff] }
 0x1b9   : > { %v853_v8 = vadd.f32 %v2499_v1, %v3455_v42  ;;  %vm983_vm11 = vcmp.ge.f32.partialorder %v953_v2, 0.0  ;;  %v991_v9 = vmul.f32 0.1, %v953_v2  ;;  %1175 = vmatmul.mubr.f32.gmra.mxu0 %v997_v57  ;;  %2761 = vmatmul.mubr.f32.vlgmr.msra.gmra.mxu1 %v998_v3  ;;  %v1548_v57 = vld [vmem:[%s4239_s7 + $0x140] sm:$0xff]  ;;  %v1545_v63 = vld [vmem:[%s4239_s7 + $0x128] sm:$0xff]  ;;  %v1511_v1 = vld [vmem:[%s4239_s7 + $0x18] sm:$0xff] }
 0x1ba   : > { %v2501_v11 = vpop.f32.mrf.mxu0  ;;  %1179 = vmatprep.mubr.f32.mxu0 %v998_v3  ;;  %1591 = vmatpush1.msra.mxu0 %v1522_v4  ;;  %v1543_v4 = vld [vmem:[%s4239_s7 + $0x118] sm:$0xff] }
 0x1bb   : > { %v958_v12 = vadd.f32 %v2721_v51, %v853_v8  ;;  %v3474_v13 = vsel %vm983_vm11, %v953_v2, %v991_v9  ;;  %v2502_v14 = vadd.f32 %v2501_v11, %v2500_v5  ;;  %1592 = vmatprep.subr.mxu0 %v3063_v0  ;;  %1794 = vmatpush1.msra.mxu1 %v1555_v7  ;;  %v1544_v2 = vld [vmem:[%s4239_s7 + $0x120] sm:$0xff]  ;;  %v1509_v5 = vld [vmem:[%s4239_s7 + $0x8] sm:$0xff]  ;;  %v1539_v9 = vld [vmem:[%s4239_s7 + $0xf8] sm:$0xff] }
 0x1bc   : > { %v2503_v15 = vpop.f32.mrf.mxu0  ;;  %2763 = vmatprep.mubr.f32.mxu1 %v3474_v13  ;;  %1593 = vmatpush1.msra.mxu0 %v1521_v10  ;;  %v1508_v7 = vld [vmem:[%s4239_s7] sm:$0xff]  ;;  %v1541_v8 = vld [vmem:[%s4239_s7 + $0x108] sm:$0xff]  ;;  %v1538_v11 = vld [vmem:[%s4239_s7 + $0xf0] sm:$0xff] }
 0x1bd   : > { %vm984_vm12 = vcmp.ge.f32.partialorder %v958_v12, 0.0  ;;  %v992_v18 = vmul.f32 0.1, %v958_v12  ;;  %1180 = vmatmul.mubr.f32.gmra.mxu0 %v998_v3  ;;  %2764 = vmatmul.mubr.f32.gmra.mxu1 %v3474_v13  ;;  %v858_v19 = vadd.f32 %v2502_v14, %v3455_v42  ;;  %v1540_v10 = vld [vmem:[%s4239_s7 + $0x100] sm:$0xff]  ;;  %v1570_v14 = vld [vmem:[%s4239_s7 + $0x1f0] sm:$0xff] }
 0x1be   : > { %v2504_v21 = vpop.f32.mrf.mxu0  ;;  %1184 = vmatprep.mubr.f32.mxu0 %v3474_v13  ;;  %1795 = vmatprep.subr.mxu1 %v3063_v0 }
 0x1bf   : > { %v2505_v22 = vadd.f32 %v2504_v21, %v2503_v15  ;;  %v963_v23 = vadd.f32 %v962_v16, %v858_v19  ;;  %v3488_v24 = vsel %vm984_vm12, %v958_v12, %v992_v18  ;;  %1594 = vmatprep.subr.mxu0 %v3063_v0  ;;  %1796 = vmatpush1.msra.mxu1 %v1554_v17  ;;  %v1571_v12 = vld [vmem:[%s4239_s7 + $0x1f8] sm:$0xff]  ;;  %v1536_v15 = vld [vmem:[%s4239_s7 + $0xe0] sm:$0xff]  ;;  %v1569_v16 = vld [vmem:[%s4239_s7 + $0x1e8] sm:$0xff] }
 0x1c0   : > { %v2506_v25 = vpop.f32.mrf.mxu0  ;;  %2766 = vmatprep.mubr.f32.mxu1 %v3488_v24  ;;  %1595 = vmatpush1.msra.mxu0 %v1520_v20  ;;  %v1535_v17 = vld [vmem:[%s4239_s7 + $0xd8] sm:$0xff]  ;;  %v1568_v18 = vld [vmem:[%s4239_s7 + $0x1e0] sm:$0xff]  ;;  %v1534_v19 = vld [vmem:[%s4239_s7 + $0xd0] sm:$0xff] }
 0x1c1   : > { %v863_v28 = vadd.f32 %v2505_v22, %v3455_v42  ;;  %vm985_vm13 = vcmp.ge.f32.partialorder %v963_v23, 0.0  ;;  %v993_v29 = vmul.f32 0.1, %v963_v23  ;;  %1185 = vmatmul.mubr.f32.gmra.mxu0 %v998_v3  ;;  %2767 = vmatmul.mubr.f32.gmra.mxu1 %v3488_v24  ;;  %v1510_v3 = vld [vmem:[%s4239_s7 + $0x10] sm:$0xff]  ;;  %v1567_v20 = vld [vmem:[%s4239_s7 + $0x1d8] sm:$0xff]  ;;  %v1533_v21 = vld [vmem:[%s4239_s7 + $0xc8] sm:$0xff] }
 0x1c2   : > { %v2507_v31 = vpop.f32.mrf.mxu0  ;;  %1189 = vmatprep.mubr.f32.mxu0 %v3474_v13  ;;  %1797 = vmatprep.subr.mxu1 %v3063_v0  ;;  %v1566_v22 = vld [vmem:[%s4239_s7 + $0x1d0] sm:$0xff] }
 0x1c3   : > { %v968_v32 = vadd.f32 %v2724_v6, %v863_v28  ;;  %v3502_v33 = vsel %vm985_vm13, %v963_v23, %v993_v29  ;;  %v2508_v34 = vadd.f32 %v2507_v31, %v2506_v25  ;;  %1596 = vmatprep.subr.mxu0 %v3063_v0  ;;  %1798 = vmatpush1.msra.mxu1 %v1553_v27  ;;  %v1542_v6 = vld [vmem:[%s4239_s7 + $0x110] sm:$0xff]  ;;  %v1532_v23 = vld [vmem:[%s4239_s7 + $0xc0] sm:$0xff]  ;;  %v1531_v25 = vld [vmem:[%s4239_s7 + $0xb8] sm:$0xff] }
 0x1c4   : > { %2769 = vmatprep.mubr.f32.mxu1 %v3502_v33  ;;  %v2509_v36 = vpop.f32.mrf.mxu0  ;;  %1597 = vmatpush1.msra.mxu0 %v1519_v30  ;;  %v1530_v27 = vld [vmem:[%s4239_s7 + $0xb0] sm:$0xff]  ;;  %v1563_v28 = vld [vmem:[%s4239_s7 + $0x1b8] sm:$0xff]  ;;  %v1529_v29 = vld [vmem:[%s4239_s7 + $0xa8] sm:$0xff] }
 0x1c5   : > { %vm986_vm14 = vcmp.ge.f32.partialorder %v968_v32, 0.0  ;;  %v994_v38 = vmul.f32 0.1, %v968_v32  ;;  %1190 = vmatmul.mubr.f32.gmra.mxu0 %v3474_v13  ;;  %2770 = vmatmul.mubr.f32.gmra.mxu1 %v3502_v33  ;;  %v868_v39 = vadd.f32 %v2508_v34, %v3455_v42  ;;  %v1562_v30 = vld [vmem:[%s4239_s7 + $0x1b0] sm:$0xff]  ;;  %v1528_v31 = vld [vmem:[%s4239_s7 + $0xa0] sm:$0xff] }
 0x1c6   : > { %1194 = vmatprep.mubr.f32.mxu0 %v3488_v24  ;;  %v2510_v41 = vpop.f32.mrf.mxu0  ;;  %1799 = vmatprep.subr.mxu1 %v3063_v0  ;;  %v1560_v34 = vld [vmem:[%s4239_s7 + $0x1a0] sm:$0xff] }
 0x1c7   : > { %v973_v43 = vadd.f32 %v972_v35, %v868_v39  ;;  %v3517_v44 = vsel %vm986_vm14, %v968_v32, %v994_v38  ;;  %v2511_v45 = vadd.f32 %v2510_v41, %v2509_v36  ;;  %1598 = vmatprep.subr.mxu0 %v3063_v0  ;;  %1800 = vmatpush1.msra.mxu1 %v1552_v37  ;;  %v1561_v32 = vld [vmem:[%s4239_s7 + $0x1a8] sm:$0xff]  ;;  %v1526_v35 = vld [vmem:[%s4239_s7 + $0x90] sm:$0xff]  ;;  %v1559_v36 = vld [vmem:[%s4239_s7 + $0x198] sm:$0xff] }
 0x1c8   : > { %2772 = vmatprep.mubr.f32.mxu1 %v3517_v44  ;;  %1599 = vmatpush1.msra.mxu0 %v1518_v40  ;;  %v1525_v37 = vld [vmem:[%s4239_s7 + $0x88] sm:$0xff]  ;;  %v1558_v38 = vld [vmem:[%s4239_s7 + $0x190] sm:$0xff]  ;;  %v1524_v39 = vld [vmem:[%s4239_s7 + $0x80] sm:$0xff] }
 0x1c9   : > { %vm987_vm15 = vcmp.ge.f32.partialorder %v973_v43, 0.0  ;;  %v995_v47 = vmul.f32 0.1, %v973_v43  ;;  %1195 = vmatmul.mubr.f32.gmra.mxu0 %v3474_v13  ;;  %2773 = vmatmul.mubr.f32.gmra.mxu1 %v3517_v44  ;;  %v873_v48 = vadd.f32 %v2511_v45, %v3455_v42  ;;  %v1550_v42 = vld [vmem:[%s4239_s7 + $0x150] sm:$0xff]  ;;  %v1537_v13 = vld [vmem:[%s4239_s7 + $0xe8] sm:$0xff]  ;;  %v1556_v41 = vld [vmem:[%s4239_s7 + $0x180] sm:$0xff] }
 0x1ca   : > { %1199 = vmatprep.mubr.f32.mxu0 %v3488_v24  ;;  %1801 = vmatprep.subr.mxu1 %v3063_v0  ;;  %v1557_v40 = vld [vmem:[%s4239_s7 + $0x188] sm:$0xff] }
 0x1cb   : > { %v3532_v50 = vsel %vm987_vm15, %v973_v43, %v995_v47  ;;  %v978_v51 = vadd.f32 %v2727_v26, %v873_v48  ;;  %1600 = vmatprep.subr.mxu0 %v3063_v0  ;;  %1802 = vmatpush1.msra.mxu1 %v1551_v46  ;;  %v1564_v26 = vld [vmem:[%s4239_s7 + $0x1c0] sm:$0xff]  ;;  %v3767_v43 = vld [vmem:[%s4239_s7 + $0x278] sm:$0xff]  ;;  %v3784_v45 = vld [vmem:[%s4239_s7 + $0x268] sm:$0xff]  ;;  %vm2343_vm15 = vcmask 228352  }
 0x1cc   : > { %2775 = vmatprep.mubr.f32.mxu1 %v3532_v50  ;;  %1601 = vmatpush1.msra.mxu0 %v1517_v49  ;;  %v3791_v46 = vld [vmem:[%s4239_s7 + $0x260] sm:$0xff]  ;;  %v3798_v47 = vld [vmem:[%s4239_s7 + $0x258] sm:$0xff]  ;;  %v3805_v48 = vld [vmem:[%s4239_s7 + $0x250] sm:$0xff] }
 0x1cd   : > { %1200 = vmatmul.mubr.f32.gmra.mxu0 %v3488_v24  ;;  %2776 = vmatmul.mubr.f32.gmra.mxu1 %v3532_v50  ;;  %vm988_vm0 = vcmp.ge.f32.partialorder %v978_v51, 0.0  ;;  %v996_v52 = vmul.f32 0.1, %v978_v51  ;;  %v3812_v49 = vld [vmem:[%s4239_s7 + $0x248] sm:$0xff] }
 0x1ce   : > { %1204 = vmatprep.mubr.f32.mxu0 %v3502_v33  ;;  %1803 = vmatprep.subr.mxu1 %v3063_v0 }
 0x1cf   : > { %v3546_v54 = vsel %vm988_vm0, %v978_v51, %v996_v52  ;;  %1602 = vmatprep.subr.mxu0 %v3063_v0  ;;  %1804 = vmatpush1.msra.mxu1 %v1550_v42  ;;  %v3825_v51 = vld [vmem:[%s4239_s7 + $0x238] sm:$0xff]  ;;  %v3833_v42 = vld [vmem:[%s4239_s7 + $0x230] sm:$0xff]  ;;  %v3840_v52 = vld [vmem:[%s4239_s7 + $0x228] sm:$0xff] }
 0x1d0   : > { %2778 = vmatprep.mubr.f32.mxu1 %v3546_v54  ;;  %1603 = vmatpush1.msra.mxu0 %v1516_v53  ;;  %v3847_v53 = vld [vmem:[%s4239_s7 + $0x220] sm:$0xff] }
 0x1d1   : > { %1205 = vmatmul.mubr.f32.gmra.mxu0 %v3488_v24  ;;  %2779 = vmatmul.mubr.f32.gmra.mxu1 %v3546_v54  ;;  %v1565_v24 = vld [vmem:[%s4239_s7 + $0x1c8] sm:$0xff] }
 0x1d2   : > { %1209 = vmatprep.mubr.f32.mxu0 %v3502_v33  ;;  %1805 = vmatprep.subr.mxu1 %v3063_v0 }
 0x1d3   : > { %1604 = vmatprep.subr.mxu0 %v3063_v0  ;;  %1806 = vmatpush1.msra.mxu1 %v1549_v55  ;;  %v3861_v55 = vld [vmem:[%s4239_s7 + $0x210] sm:$0xff] }
 0x1d4   : > { %1605 = vmatpush1.msra.mxu0 %v1515_v56  ;;  %1807 = vmatprep.subr.mxu1 %v3063_v0  ;;  %v3868_v56 = vld [vmem:[%s4239_s7 + $0x208] sm:$0xff] }
 0x1d5   : > { %1210 = vmatmul.mubr.f32.gmra.mxu0 %v3502_v33  ;;  %1606 = vmatprep.subr.mxu0 %v3063_v0 }
 0x1d6   : > { %1214 = vmatprep.mubr.f32.mxu0 %v3517_v44  ;;  %1808 = vmatpush1.msra.mxu1 %v1548_v57  ;;  %v3875_v57 = vld [vmem:[%s4239_s7 + $0x200] sm:$0xff] }
 0x1d7   : > { %1607 = vmatpush1.msra.mxu0 %v1514_v58  ;;  %1809 = vmatprep.subr.mxu1 %v3063_v0 }
 0x1d8   : > { %1608 = vmatprep.subr.mxu0 %v3063_v0  ;;  %1810 = vmatpush1.msra.mxu1 %v1547_v59 }
 0x1d9   : > { %1215 = vmatmul.mubr.f32.gmra.mxu0 %v3502_v33  ;;  %1811 = vmatprep.subr.mxu1 %v3063_v0  ;;  %v1527_v33 = vld [vmem:[%s4239_s7 + $0x98] sm:$0xff] }
 0x1da   : > { %1219 = vmatprep.mubr.f32.mxu0 %v3517_v44  ;;  %1609 = vmatpush1.msra.mxu0 %v1513_v60  ;;  %v3882_v60 = vld [vmem:[%s4238_s6] ss:$0 sm:$0xff] }
 0x1db   : > { %1610 = vmatprep.subr.mxu0 %v3063_v0  ;;  %1812 = vmatpush1.msra.mxu1 %v1546_v61 }
 0x1dc   : > { %1611 = vmatpush1.msra.mxu0 %v1512_v62  ;;  %1813 = vmatprep.subr.mxu1 %v3063_v0 }
 0x1dd   : > { %1220 = vmatmul.mubr.f32.gmra.mxu0 %v3517_v44  ;;  %1612 = vmatprep.subr.mxu0 %v3063_v0 }
 0x1de   : > { %1224 = vmatprep.mubr.f32.mxu0 %v3532_v50  ;;  %1814 = vmatpush1.msra.mxu1 %v1545_v63 }
 0x1df   : > { %1613 = vmatpush1.msra.mxu0 %v1511_v1  ;;  %1815 = vmatprep.subr.mxu1 %v3063_v0 }
 0x1e0   : > { %1614 = vmatprep.subr.mxu0 %v3063_v0  ;;  %1816 = vmatpush1.msra.mxu1 %v1544_v2 }
 0x1e1   : > { %1225 = vmatmul.mubr.f32.gmra.mxu0 %v3517_v44  ;;  %1817 = vmatprep.subr.mxu1 %v3063_v0  ;;  %v3777_v44 = vld [vmem:[%s4239_s7 + $0x270] sm:$0xff] }
 0x1e2   : > { %1229 = vmatprep.mubr.f32.mxu0 %v3532_v50  ;;  %1615 = vmatpush1.msra.mxu0 %v1510_v3 }
 0x1e3   : > { %1616 = vmatprep.subr.mxu0 %v3063_v0  ;;  %1818 = vmatpush1.msra.mxu1 %v1543_v4 }
 0x1e4   : > { %1617 = vmatpush1.msra.mxu0 %v1509_v5  ;;  %1819 = vmatprep.subr.mxu1 %v3063_v0 }
 0x1e5   : > { %1230 = vmatmul.mubr.f32.gmra.mxu0 %v3532_v50  ;;  %1618 = vmatprep.subr.mxu0 %v3063_v0 }
 0x1e6   : > { %1234 = vmatprep.mubr.f32.mxu0 %v3546_v54  ;;  %1820 = vmatpush1.msra.mxu1 %v1542_v6  ;;  %v3854_v54 = vld [vmem:[%s4239_s7 + $0x218] sm:$0xff] }
 0x1e7   : > { %1619 = vmatpush1.msra.mxu0 %v1508_v7  ;;  %1821 = vmatprep.subr.mxu1 %v3063_v0 }
 0x1e8   : > { %1620 = vmatprep.subr.mxu0 %v3063_v0  ;;  %1822 = vmatpush1.msra.mxu1 %v1541_v8 }
 0x1e9   : > { %1235 = vmatmul.mubr.f32.gmra.mxu0 %v3532_v50  ;;  %1823 = vmatprep.subr.mxu1 %v3063_v0  ;;  %v3817_v50 = vld [vmem:[%s4239_s7 + $0x240] sm:$0xff] }
 0x1ea   : > { %1621 = vmatpush2.msra.mxu0 %v1539_v9  ;;  %1824 = vmatpush1.msra.mxu1 %v1540_v10 }
 0x1eb   : > { %1622 = vmatprep.subr.mxu0 %v3063_v0  ;;  %1825 = vmatprep.subr.mxu1 %v3063_v0 }
 0x1ec   : > { %1623 = vmatpush2.msra.mxu0 %v1538_v11  ;;  %1826 = vmatpush2.msra.mxu1 %v1571_v12 }
 0x1ed   : > { %1624 = vmatprep.subr.mxu0 %v3063_v0  ;;  %1827 = vmatprep.subr.mxu1 %v3063_v0 }
 0x1ee   : > { %1625 = vmatpush2.msra.mxu0 %v1537_v13  ;;  %1828 = vmatpush2.msra.mxu1 %v1570_v14 }
 0x1ef   : > { %1626 = vmatprep.subr.mxu0 %v3063_v0  ;;  %1829 = vmatprep.subr.mxu1 %v3063_v0 }
 0x1f0   : > { %1627 = vmatpush2.msra.mxu0 %v1536_v15  ;;  %1830 = vmatpush2.msra.mxu1 %v1569_v16 }
 0x1f1   : > { %1628 = vmatprep.subr.mxu0 %v3063_v0  ;;  %1831 = vmatprep.subr.mxu1 %v3063_v0 }
 0x1f2   : > { %1629 = vmatpush2.msra.mxu0 %v1535_v17  ;;  %1832 = vmatpush2.msra.mxu1 %v1568_v18 }
 0x1f3   : > { %1630 = vmatprep.subr.mxu0 %v3063_v0  ;;  %1833 = vmatprep.subr.mxu1 %v3063_v0 }
 0x1f4   : > { %1631 = vmatpush2.msra.mxu0 %v1534_v19  ;;  %1834 = vmatpush2.msra.mxu1 %v1567_v20 }
 0x1f5   : > { %1632 = vmatprep.subr.mxu0 %v3063_v0  ;;  %1835 = vmatprep.subr.mxu1 %v3063_v0 }
 0x1f6   : > { %1633 = vmatpush2.msra.mxu0 %v1533_v21  ;;  %1836 = vmatpush2.msra.mxu1 %v1566_v22 }
 0x1f7   : > { %1634 = vmatprep.subr.mxu0 %v3063_v0  ;;  %1837 = vmatprep.subr.mxu1 %v3063_v0 }
 0x1f8   : > { %1635 = vmatpush2.msra.mxu0 %v1532_v23  ;;  %1838 = vmatpush2.msra.mxu1 %v1565_v24 }
 0x1f9   : > { %1636 = vmatprep.subr.mxu0 %v3063_v0  ;;  %1839 = vmatprep.subr.mxu1 %v3063_v0 }
 0x1fa   : > { %1637 = vmatpush2.msra.mxu0 %v1531_v25  ;;  %1840 = vmatpush2.msra.mxu1 %v1564_v26 }
 0x1fb   : > { %1638 = vmatprep.subr.mxu0 %v3063_v0  ;;  %1841 = vmatprep.subr.mxu1 %v3063_v0 }
 0x1fc   : > { %1639 = vmatpush2.msra.mxu0 %v1530_v27  ;;  %1842 = vmatpush2.msra.mxu1 %v1563_v28 }
 0x1fd   : > { %1640 = vmatprep.subr.mxu0 %v3063_v0  ;;  %1843 = vmatprep.subr.mxu1 %v3063_v0 }
 0x1fe   : > { %1641 = vmatpush2.msra.mxu0 %v1529_v29  ;;  %1844 = vmatpush2.msra.mxu1 %v1562_v30 }
 0x1ff   : > { %1642 = vmatprep.subr.mxu0 %v3063_v0  ;;  %1845 = vmatprep.subr.mxu1 %v3063_v0 }
 0x200   : > { %1643 = vmatpush2.msra.mxu0 %v1528_v31  ;;  %1846 = vmatpush2.msra.mxu1 %v1561_v32 }
 0x201   : > { %1644 = vmatprep.subr.mxu0 %v3063_v0  ;;  %1847 = vmatprep.subr.mxu1 %v3063_v0 }
 0x202   : > { %1645 = vmatpush2.msra.mxu0 %v1527_v33  ;;  %1848 = vmatpush2.msra.mxu1 %v1560_v34 }
 0x203   : > { %1646 = vmatprep.subr.mxu0 %v3063_v0  ;;  %1849 = vmatprep.subr.mxu1 %v3063_v0 }
 0x204   : > { %1647 = vmatpush2.msra.mxu0 %v1526_v35  ;;  %1850 = vmatpush2.msra.mxu1 %v1559_v36 }
 0x205   : > { %1648 = vmatprep.subr.mxu0 %v3063_v0  ;;  %1851 = vmatprep.subr.mxu1 %v3063_v0 }
 0x206   : > { %1649 = vmatpush2.msra.mxu0 %v1525_v37  ;;  %1852 = vmatpush2.msra.mxu1 %v1558_v38 }
 0x207   : > { %1650 = vmatprep.subr.mxu0 %v3063_v0  ;;  %1652 = vmatprep.mubr.f32.mxu0 %v3063_v0 }
 0x208   : > { %1651 = vmatpush2.msra.mxu0 %v1524_v39  ;;  %1853 = vmatprep.subr.mxu1 %v3063_v0 }
 0x209   : > { %1653 = vmatmul.mubr.f32.vlgmr.msra.gmra.mxu0 %v3063_v0  ;;  %1854 = vmatpush2.msra.mxu1 %v1557_v40 }
 0x20a   : > { %1855 = vmatprep.subr.mxu1 %v3063_v0  ;;  %2781 = vmatprep.subr.mxu0 %v3767_v43 }
 0x20b   : > { %1856 = vmatpush2.msra.mxu1 %v1556_v41  ;;  %2782 = vmatpush3.msra.mxu0 %v3767_v43 }
 0x20c   : > { %2855 = vmatprep.subr.mxu1 %v3767_v43  ;;  %2783 = vmatprep.subr.mxu0 %v3777_v44 }
 0x20d   : > { %2784 = vmatpush3.msra.mxu0 %v3777_v44 }
 0x20e   : > { %2785 = vmatprep.subr.mxu0 %v3784_v45 }
 0x20f   : > { %2786 = vmatpush3.msra.mxu0 %v3784_v45 }
 0x210   : > { %2787 = vmatprep.subr.mxu0 %v3791_v46 }
 0x211   : > { %2788 = vmatpush3.msra.mxu0 %v3791_v46 }
 0x212   : > { %2789 = vmatprep.subr.mxu0 %v3798_v47 }
 0x213   : > { %2790 = vmatpush3.msra.mxu0 %v3798_v47 }
 0x214   : > { %2791 = vmatprep.subr.mxu0 %v3805_v48 }
 0x215   : > { %2792 = vmatpush3.msra.mxu0 %v3805_v48 }
 0x216   : > { %2793 = vmatprep.subr.mxu0 %v3812_v49 }
 0x217   : > { %2794 = vmatpush3.msra.mxu0 %v3812_v49 }
 0x218   : > { %2795 = vmatprep.subr.mxu0 %v3817_v50 }
 0x219   : > { %2796 = vmatpush3.msra.mxu0 %v3817_v50 }
 0x21a   : > { %2797 = vmatprep.subr.mxu0 %v3825_v51 }
 0x21b   : > { %2798 = vmatpush3.msra.mxu0 %v3825_v51 }
 0x21c   : > { %2799 = vmatprep.subr.mxu0 %v3833_v42 }
 0x21d   : > { %2800 = vmatpush3.msra.mxu0 %v3833_v42 }
 0x21e   : > { %2801 = vmatprep.subr.mxu0 %v3840_v52 }
 0x21f   : > { %2802 = vmatpush3.msra.mxu0 %v3840_v52 }
 0x220   : > { %2803 = vmatprep.subr.mxu0 %v3847_v53 }
 0x221   : > { %2804 = vmatpush3.msra.mxu0 %v3847_v53 }
 0x222   : > { %2805 = vmatprep.subr.mxu0 %v3854_v54 }
 0x223   : > { %2806 = vmatpush3.msra.mxu0 %v3854_v54 }
 0x224   : > { %2807 = vmatprep.subr.mxu0 %v3861_v55 }
 0x225   : > { %2808 = vmatpush3.msra.mxu0 %v3861_v55 }
 0x226   : > { %2809 = vmatprep.subr.mxu0 %v3868_v56 }
 0x227   : > { %2810 = vmatpush3.msra.mxu0 %v3868_v56 }
 0x228   : > { %2811 = vmatprep.subr.mxu0 %v3875_v57 }
 0x229   : > { %2812 = vmatpush3.msra.mxu0 %v3875_v57 }
 0x275   : > { %v2568_v58 = vpop.f32.mrf.mxu0 }
 0x277   : > { %v2569_v59 = vpop.f32.mrf.mxu0 }
 0x278   : > { %v2570_v61 = vadd.f32 %v2569_v59, %v2568_v58 }
 0x279   : > { %v2571_v62 = vpop.f32.mrf.mxu0  ;;  %v2762_v63 = vpop.f32.mrf.mxu1 }
 0x27a   : > { %v1172_v1 = vadd.f32 %v2570_v61, %v3882_v60 }
 0x27b   : > { %v2572_v2 = vpop.f32.mrf.mxu0  ;;  %v1306_v3 = vpop.f32.mrf.mxu1 }
 0x27c   : > { %v2573_v4 = vadd.f32 %v2572_v2, %v2571_v62  ;;  %v1307_v5 = vadd.f32 %v1306_v3, %v1172_v1 }
 0x27d   : > { %v2574_v6 = vpop.f32.mrf.mxu0  ;;  %v2765_v9 = vpop.f32.mrf.mxu1 }
 0x27e   : > { %v1177_v7 = vadd.f32 %v2573_v4, %v3882_v60  ;;  %vm1375_vm1 = vcmp.ge.f32.partialorder %v1307_v5, 0.0  ;;  %v1389_v8 = vmul.f32 0.1, %v1307_v5 }
 0x27f   : > { %v2575_v10 = vpop.f32.mrf.mxu0  ;;  %v1316_v17 = vpop.f32.mrf.mxu1 }
 0x280   : > { %v1312_v11 = vadd.f32 %v2762_v63, %v1177_v7  ;;  %v1403_v12 = vsel %vm1375_vm1, %v1307_v5, %v1389_v8  ;;  %v2576_v13 = vadd.f32 %v2575_v10, %v2574_v6 }
 0x281   : > { %v2577_v14 = vpop.f32.mrf.mxu0  ;;  %1657 = vmatprep.mubr.f32.mxu0 %v1403_v12  ;;  %1857 = vmatprep.mubr.f32.mxu1 %v1403_v12  ;;  %v2768_v31 = vpop.f32.mrf.mxu1 }
 0x282   : > { %vm1376_vm2 = vcmp.ge.f32.partialorder %v1312_v11, 0.0  ;;  %v1390_v15 = vmul.f32 0.1, %v1312_v11  ;;  %v1182_v16 = vadd.f32 %v2576_v13, %v3882_v60  ;;  %1658 = vmatmul.mubr.f32.gmra.mxu0 %v3063_v0  ;;  %1858 = vmatmul.mubr.f32.vlgmr.msra.gmra.mxu1 %v1403_v12 }
 0x283   : > { %2871 = vmatpush3.msra.mxu1 %v3767_v43  ;;  %v2578_v18 = vpop.f32.mrf.mxu0  ;;  %1662 = vmatprep.mubr.f32.mxu0 %v1403_v12  ;;  %v1326_v36 = vpop.f32.mrf.mxu1 }
 0x284   : > { %v3889_v19 = vsel %vm1376_vm2, %v1312_v11, %v1390_v15  ;;  %v1317_v20 = vadd.f32 %v1316_v17, %v1182_v16  ;;  %v2579_v21 = vadd.f32 %v2578_v18, %v2577_v14  ;;  %2856 = vmatprep.subr.mxu1 %v3777_v44 }
 0x285   : > { %v2580_v22 = vpop.f32.mrf.mxu0  ;;  %1862 = vmatprep.mubr.f32.mxu1 %v3889_v19  ;;  %2872 = vmatpush3.msra.mxu1 %v3777_v44  ;;  %v2771_v58 = vpop.f32.mrf.mxu1 }
 0x286   : > { %v1391_v23 = vmul.f32 0.1, %v1317_v20  ;;  %v1187_v24 = vadd.f32 %v2579_v21, %v3882_v60  ;;  %1663 = vmatmul.mubr.f32.gmra.mxu0 %v1403_v12  ;;  %1863 = vmatmul.mubr.f32.gmra.mxu1 %v1403_v12  ;;  %vm1377_vm3 = vcmp.ge.f32.partialorder %v1317_v20, 0.0 }
 0x287   : > { %v2581_v25 = vpop.f32.mrf.mxu0  ;;  %1667 = vmatprep.mubr.f32.mxu0 %v3889_v19  ;;  %1867 = vmatprep.mubr.f32.mxu1 %v3889_v19  ;;  %v1336_v62 = vpop.f32.mrf.mxu1 }
 0x288   : > { %2857 = vmatprep.subr.mxu1 %v3784_v45  ;;  %v3899_v27 = vsel %vm1377_vm3, %v1317_v20, %v1391_v23  ;;  %v1322_v28 = vadd.f32 %v2765_v9, %v1187_v24  ;;  %v2582_v29 = vadd.f32 %v2581_v25, %v2580_v22 }
 0x289   : > { %v2583_v26 = vpop.f32.mrf.mxu0  ;;  %2873 = vmatpush3.msra.mxu1 %v3784_v45  ;;  %v2774_v8 = vpop.f32.mrf.mxu1 }
 0x28a   : > { %1668 = vmatmul.mubr.f32.gmra.mxu0 %v1403_v12  ;;  %1868 = vmatmul.mubr.f32.gmra.mxu1 %v3889_v19  ;;  %v1392_v33 = vmul.f32 0.1, %v1322_v28  ;;  %v1192_v34 = vadd.f32 %v2582_v29, %v3882_v60  ;;  %vm1378_vm4 = vcmp.ge.f32.partialorder %v1322_v28, 0.0 }
 0x28b   : > { %v2584_v30 = vpop.f32.mrf.mxu0  ;;  %1672 = vmatprep.mubr.f32.mxu0 %v3889_v19  ;;  %1872 = vmatprep.mubr.f32.mxu1 %v3899_v27  ;;  %v1346_v11 = vpop.f32.mrf.mxu1 }
 0x28c   : > { %2858 = vmatprep.subr.mxu1 %v3791_v46  ;;  %v3913_v37 = vsel %vm1378_vm4, %v1322_v28, %v1392_v33  ;;  %v1327_v38 = vadd.f32 %v1326_v36, %v1192_v34  ;;  %v2585_v39 = vadd.f32 %v2584_v30, %v2583_v26 }
 0x28d   : > { %v2586_v32 = vpop.f32.mrf.mxu0  ;;  %2874 = vmatpush3.msra.mxu1 %v3791_v46  ;;  %v2777_v21 = vpop.f32.mrf.mxu1 }
 0x28e   : > { %1673 = vmatmul.mubr.f32.gmra.mxu0 %v3889_v19  ;;  %1873 = vmatmul.mubr.f32.gmra.mxu1 %v3889_v19  ;;  %v1393_v41 = vmul.f32 0.1, %v1327_v38  ;;  %v1197_v43 = vadd.f32 %v2585_v39, %v3882_v60  ;;  %vm1379_vm5 = vcmp.ge.f32.partialorder %v1327_v38, 0.0 }
 0x28f   : > { %v2587_v35 = vpop.f32.mrf.mxu0  ;;  %1677 = vmatprep.mubr.f32.mxu0 %v3899_v27  ;;  %1877 = vmatprep.mubr.f32.mxu1 %v3899_v27  ;;  %v1356_v24 = vpop.f32.mrf.mxu1 }
 0x290   : > { %2859 = vmatprep.subr.mxu1 %v3798_v47  ;;  %v3928_v45 = vsel %vm1379_vm5, %v1327_v38, %v1393_v41  ;;  %v1332_v46 = vadd.f32 %v2768_v31, %v1197_v43 }
 0x291   : > { %2875 = vmatpush3.msra.mxu1 %v3798_v47  ;;  %v2589_v40 = vpop.f32.mrf.mxu0  ;;  %v2588_v47 = vadd.f32 %v2587_v35, %v2586_v32  ;;  %v2780_v38 = vpop.f32.mrf.mxu1 }
 0x292   : > { %1678 = vmatmul.mubr.f32.gmra.mxu0 %v3889_v19  ;;  %1878 = vmatmul.mubr.f32.gmra.mxu1 %v3899_v27  ;;  %v1394_v59 = vmul.f32 0.1, %v1332_v46  ;;  %vm1380_vm6 = vcmp.ge.f32.partialorder %v1332_v46, 0.0 }
 0x293   : > { %1682 = vmatprep.mubr.f32.mxu0 %v3899_v27  ;;  %1882 = vmatprep.mubr.f32.mxu1 %v3913_v37  ;;  %v2590_v44 = vpop.f32.mrf.mxu0  ;;  %v1366_v41 = vpop.f32.mrf.mxu1 }
 0x294   : > { %2860 = vmatprep.subr.mxu1 %v3805_v48  ;;  %v3943_v63 = vsel %vm1380_vm6, %v1332_v46, %v1394_v59  ;;  %v2591_v1 = vadd.f32 %v2590_v44, %v2589_v40 }
 0x295   : > { %2876 = vmatpush3.msra.mxu1 %v3805_v48  ;;  %v2592_v48 = vpop.f32.mrf.mxu0 }
 0x296   : > { %1683 = vmatmul.mubr.f32.gmra.mxu0 %v3899_v27  ;;  %1883 = vmatmul.mubr.f32.gmra.mxu1 %v3899_v27 }
 0x297   : > { %1687 = vmatprep.mubr.f32.mxu0 %v3913_v37  ;;  %1887 = vmatprep.mubr.f32.mxu1 %v3913_v37  ;;  %v2593_v61 = vpop.f32.mrf.mxu0 }
 0x298   : > { %2861 = vmatprep.subr.mxu1 %v3812_v49  ;;  %v2594_v6 = vadd.f32 %v2593_v61, %v2592_v48 }
 0x299   : > { %2877 = vmatpush3.msra.mxu1 %v3812_v49  ;;  %v1202_v49 = vadd.f32 %v2588_v47, %v3882_v60  ;;  %v2595_v2 = vpop.f32.mrf.mxu0 }
 0x29a   : > { %1688 = vmatmul.mubr.f32.gmra.mxu0 %v3899_v27  ;;  %1888 = vmatmul.mubr.f32.gmra.mxu1 %v3913_v37 }
 0x29b   : > { %1692 = vmatprep.mubr.f32.mxu0 %v3913_v37  ;;  %1892 = vmatprep.mubr.f32.mxu1 %v3928_v45  ;;  %v2596_v4 = vpop.f32.mrf.mxu0 }
 0x29c   : > { %2862 = vmatprep.subr.mxu1 %v3817_v50  ;;  %v2597_v13 = vadd.f32 %v2596_v4, %v2595_v2 }
 0x29d   : > { %2878 = vmatpush3.msra.mxu1 %v3817_v50  ;;  %v1337_v50 = vadd.f32 %v1336_v62, %v1202_v49  ;;  %v2598_v7 = vpop.f32.mrf.mxu0 }
 0x29e   : > { %1693 = vmatmul.mubr.f32.gmra.mxu0 %v3913_v37  ;;  %1893 = vmatmul.mubr.f32.gmra.mxu1 %v3913_v37 }
 0x29f   : > { %1697 = vmatprep.mubr.f32.mxu0 %v3928_v45  ;;  %1897 = vmatprep.mubr.f32.mxu1 %v3928_v45  ;;  %v1395_v3 = vmul.f32 0.1, %v1337_v50  ;;  %vm1381_vm7 = vcmp.ge.f32.partialorder %v1337_v50, 0.0  ;;  %v2599_v10 = vpop.f32.mrf.mxu0 }
 0x2a0   : > { %2863 = vmatprep.subr.mxu1 %v3825_v51  ;;  %v2600_v18 = vadd.f32 %v2599_v10, %v2598_v7 }
 0x2a1   : > { %2879 = vmatpush3.msra.mxu1 %v3825_v51  ;;  %v1207_v51 = vadd.f32 %v2591_v1, %v3882_v60  ;;  %v3958_v5 = vsel %vm1381_vm7, %v1337_v50, %v1395_v3  ;;  %v2601_v14 = vpop.f32.mrf.mxu0 }
 0x2a2   : > { %1698 = vmatmul.mubr.f32.gmra.mxu0 %v3913_v37  ;;  %1898 = vmatmul.mubr.f32.gmra.mxu1 %v3928_v45 }
 0x2a3   : > { %1702 = vmatprep.mubr.f32.mxu0 %v3928_v45  ;;  %1902 = vmatprep.mubr.f32.mxu1 %v3943_v63  ;;  %v2602_v16 = vpop.f32.mrf.mxu0 }
 0x2a4   : > { %2864 = vmatprep.subr.mxu1 %v3833_v42  ;;  %v2603_v28 = vadd.f32 %v2602_v16, %v2601_v14 }
 0x2a5   : > { %2880 = vmatpush3.msra.mxu1 %v3833_v42  ;;  %v1342_v42 = vadd.f32 %v2771_v58, %v1207_v51  ;;  %v2604_v20 = vpop.f32.mrf.mxu0 }
 0x2a6   : > { %1703 = vmatmul.mubr.f32.gmra.mxu0 %v3928_v45  ;;  %1903 = vmatmul.mubr.f32.gmra.mxu1 %v3928_v45  ;;  %v1227_v30 = vadd.f32 %v2603_v28, %v3882_v60 }
 0x2a7   : > { %1707 = vmatprep.mubr.f32.mxu0 %v3943_v63  ;;  %1907 = vmatprep.mubr.f32.mxu1 %v3943_v63  ;;  %v1396_v9 = vmul.f32 0.1, %v1342_v42  ;;  %vm1382_vm8 = vcmp.ge.f32.partialorder %v1342_v42, 0.0  ;;  %v2605_v23 = vpop.f32.mrf.mxu0 }
 0x2a8   : > { %2865 = vmatprep.subr.mxu1 %v3840_v52  ;;  %v1362_v34 = vadd.f32 %v2777_v21, %v1227_v30  ;;  %v2606_v35 = vadd.f32 %v2605_v23, %v2604_v20 }
 0x2a9   : > { %2881 = vmatpush3.msra.mxu1 %v3840_v52  ;;  %v1212_v52 = vadd.f32 %v2594_v6, %v3882_v60  ;;  %v3973_v12 = vsel %vm1382_vm8, %v1342_v42, %v1396_v9 }
 0x2aa   : > { %1708 = vmatmul.mubr.f32.gmra.mxu0 %v3928_v45  ;;  %1908 = vmatmul.mubr.f32.gmra.mxu1 %v3943_v63  ;;  %v1400_v39 = vmul.f32 0.1, %v1362_v34  ;;  %v1232_v40 = vadd.f32 %v2606_v35, %v3882_v60  ;;  %vm1386_vm12 = vcmp.ge.f32.partialorder %v1362_v34, 0.0 }
 0x2ab   : > { %1712 = vmatprep.mubr.f32.mxu0 %v3943_v63  ;;  %1912 = vmatprep.mubr.f32.mxu1 %v3958_v5 }
 0x2ac   : > { %2866 = vmatprep.subr.mxu1 %v3847_v53  ;;  %v1414_v43 = vsel %vm1386_vm12, %v1362_v34, %v1400_v39  ;;  %v1367_v44 = vadd.f32 %v1366_v41, %v1232_v40 }
 0x2ad   : > { %2882 = vmatpush3.msra.mxu1 %v3847_v53  ;;  %v1347_v53 = vadd.f32 %v1346_v11, %v1212_v52 }
 0x2ae   : > { %1713 = vmatmul.mubr.f32.gmra.mxu0 %v3943_v63  ;;  %1913 = vmatmul.mubr.f32.gmra.mxu1 %v3943_v63  ;;  %v1401_v47 = vmul.f32 0.1, %v1367_v44  ;;  %vm1387_vm13 = vcmp.ge.f32.partialorder %v1367_v44, 0.0 }
 0x2af   : > { %1717 = vmatprep.mubr.f32.mxu0 %v3958_v5  ;;  %1917 = vmatprep.mubr.f32.mxu1 %v3958_v5  ;;  %v1397_v15 = vmul.f32 0.1, %v1347_v53  ;;  %vm1383_vm9 = vcmp.ge.f32.partialorder %v1347_v53, 0.0 }
 0x2b0   : > { %2867 = vmatprep.subr.mxu1 %v3854_v54  ;;  %v1415_v58 = vsel %vm1387_vm13, %v1367_v44, %v1401_v47 }
 0x2b1   : > { %2883 = vmatpush3.msra.mxu1 %v3854_v54  ;;  %v1217_v54 = vadd.f32 %v2597_v13, %v3882_v60  ;;  %v3988_v17 = vsel %vm1383_vm9, %v1347_v53, %v1397_v15 }
 0x2b2   : > { %1718 = vmatmul.mubr.f32.gmra.mxu0 %v3943_v63  ;;  %1918 = vmatmul.mubr.f32.gmra.mxu1 %v3958_v5 }
 0x2b3   : > { %1722 = vmatprep.mubr.f32.mxu0 %v3958_v5  ;;  %1922 = vmatprep.mubr.f32.mxu1 %v3973_v12 }
 0x2b4   : > { %2868 = vmatprep.subr.mxu1 %v3861_v55 }
 0x2b5   : > { %2884 = vmatpush3.msra.mxu1 %v3861_v55  ;;  %v1352_v55 = vadd.f32 %v2774_v8, %v1217_v54 }
 0x2b6   : > { %1723 = vmatmul.mubr.f32.gmra.mxu0 %v3958_v5  ;;  %1923 = vmatmul.mubr.f32.gmra.mxu1 %v3958_v5 }
 0x2b7   : > { %1727 = vmatprep.mubr.f32.mxu0 %v3973_v12  ;;  %1927 = vmatprep.mubr.f32.mxu1 %v3973_v12  ;;  %v1398_v22 = vmul.f32 0.1, %v1352_v55  ;;  %vm1384_vm10 = vcmp.ge.f32.partialorder %v1352_v55, 0.0 }
 0x2b8   : > { %2869 = vmatprep.subr.mxu1 %v3868_v56 }
 0x2b9   : > { %2885 = vmatpush3.msra.mxu1 %v3868_v56  ;;  %v1222_v56 = vadd.f32 %v2600_v18, %v3882_v60  ;;  %v4001_v25 = vsel %vm1384_vm10, %v1352_v55, %v1398_v22 }
 0x2ba   : > { %1728 = vmatmul.mubr.f32.gmra.mxu0 %v3958_v5  ;;  %1928 = vmatmul.mubr.f32.gmra.mxu1 %v3973_v12 }
 0x2bb   : > { %1732 = vmatprep.mubr.f32.mxu0 %v3973_v12  ;;  %1932 = vmatprep.mubr.f32.mxu1 %v3988_v17  ;;  %v1357_v26 = vadd.f32 %v1356_v24, %v1222_v56 }
 0x2bc   : > { %2870 = vmatprep.subr.mxu1 %v3875_v57 }
 0x2bd   : > { %2886 = vmatpush3.msra.mxu1 %v3875_v57  ;;  %v2607_v57 = vpop.f32.mrf.mxu0  ;;  %v1399_v29 = vmul.f32 0.1, %v1357_v26  ;;  %vm1385_vm11 = vcmp.ge.f32.partialorder %v1357_v26, 0.0 }
 0x2be   : > { %1733 = vmatmul.mubr.f32.gmra.mxu0 %v3973_v12  ;;  %1933 = vmatmul.mubr.f32.gmra.mxu1 %v3973_v12 }
 0x2bf   : > { %1737 = vmatprep.mubr.f32.mxu0 %v3988_v17  ;;  %1937 = vmatprep.mubr.f32.mxu1 %v3988_v17  ;;  %v2608_v31 = vpop.f32.mrf.mxu0  ;;  %v4014_v33 = vsel %vm1385_vm11, %v1357_v26, %v1399_v29 }
 0x2c0   : > { %v2609_v46 = vadd.f32 %v2608_v31, %v2607_v57 }
 0x2c2   : > { %1738 = vmatmul.mubr.f32.gmra.mxu0 %v3973_v12  ;;  %1938 = vmatmul.mubr.f32.gmra.mxu1 %v3988_v17  ;;  %v1237_v48 = vadd.f32 %v2609_v46, %v3882_v60 }
 0x2c3   : > { %1742 = vmatprep.mubr.f32.mxu0 %v3988_v17  ;;  %1942 = vmatprep.mubr.f32.mxu1 %v4001_v25 }
 0x2c4   : > { %v1372_v59 = vadd.f32 %v2780_v38, %v1237_v48 }
 0x2c6   : > { %1743 = vmatmul.mubr.f32.gmra.mxu0 %v3988_v17  ;;  %1943 = vmatmul.mubr.f32.gmra.mxu1 %v3988_v17  ;;  %v1402_v49 = vmul.f32 0.1, %v1372_v59  ;;  %vm1388_vm14 = vcmp.ge.f32.partialorder %v1372_v59, 0.0 }
 0x2c7   : > { %1747 = vmatprep.mubr.f32.mxu0 %v4001_v25  ;;  %1947 = vmatprep.mubr.f32.mxu1 %v4001_v25 }
 0x2c8   : > { %v1416_v60 = vsel %vm1388_vm14, %v1372_v59, %v1402_v49 }
 0x2c9   : > { %v4012_v32 = vpop.f32.mrf.mxu0 }
 0x2ca   : > { %1748 = vmatmul.mubr.f32.gmra.mxu0 %v3988_v17  ;;  %1948 = vmatmul.mubr.f32.gmra.mxu1 %v4001_v25 }
 0x2cb   : > { %1752 = vmatprep.mubr.f32.mxu0 %v4001_v25  ;;  %1952 = vmatprep.mubr.f32.mxu1 %v4014_v33  ;;  %v1656_v36 = vpop.f32.mrf.mxu0 }
 0x2ce   : > { %1753 = vmatmul.mubr.f32.gmra.mxu0 %v4001_v25  ;;  %1953 = vmatmul.mubr.f32.gmra.mxu1 %v4001_v25 }
 0x2cf   : > { %1757 = vmatprep.mubr.f32.mxu0 %v4014_v33  ;;  %1957 = vmatprep.mubr.f32.mxu1 %v4014_v33 }
 0x2d2   : > { %1758 = vmatmul.mubr.f32.gmra.mxu0 %v4001_v25  ;;  %1958 = vmatmul.mubr.f32.gmra.mxu1 %v4014_v33 }
 0x2d3   : > { %1762 = vmatprep.mubr.f32.mxu0 %v4014_v33  ;;  %1962 = vmatprep.mubr.f32.mxu1 %v1414_v43 }
 0x2d6   : > { %1763 = vmatmul.mubr.f32.gmra.mxu0 %v4014_v33  ;;  %1963 = vmatmul.mubr.f32.gmra.mxu1 %v4014_v33 }
 0x2d7   : > { %1767 = vmatprep.mubr.f32.mxu0 %v1414_v43  ;;  %1967 = vmatprep.mubr.f32.mxu1 %v1414_v43 }
 0x2da   : > { %1768 = vmatmul.mubr.f32.gmra.mxu0 %v4014_v33  ;;  %1968 = vmatmul.mubr.f32.gmra.mxu1 %v1414_v43 }
 0x2db   : > { %1772 = vmatprep.mubr.f32.mxu0 %v1414_v43  ;;  %1972 = vmatprep.mubr.f32.mxu1 %v1415_v58 }
 0x2de   : > { %1773 = vmatmul.mubr.f32.gmra.mxu0 %v1414_v43  ;;  %1973 = vmatmul.mubr.f32.gmra.mxu1 %v1414_v43 }
 0x2df   : > { %1777 = vmatprep.mubr.f32.mxu0 %v1415_v58  ;;  %1977 = vmatprep.mubr.f32.mxu1 %v1415_v58 }
 0x2e2   : > { %1778 = vmatmul.mubr.f32.gmra.mxu0 %v1414_v43  ;;  %1978 = vmatmul.mubr.f32.gmra.mxu1 %v1415_v58 }
 0x2e3   : > { %1782 = vmatprep.mubr.f32.mxu0 %v1415_v58  ;;  %1982 = vmatprep.mubr.f32.mxu1 %v1416_v60 }
 0x2e6   : > { %1783 = vmatmul.mubr.f32.gmra.mxu0 %v1415_v58  ;;  %1983 = vmatmul.mubr.f32.gmra.mxu1 %v1415_v58 }
 0x2e7   : > { %1787 = vmatprep.mubr.f32.mxu0 %v1416_v60  ;;  %1987 = vmatprep.mubr.f32.mxu1 %v1416_v60 }
 0x2ea   : > { %1788 = vmatmul.mubr.f32.gmra.mxu0 %v1415_v58  ;;  %1988 = vmatmul.mubr.f32.gmra.mxu1 %v1416_v60 }
 0x2eb   : > { %2813 = vmatprep.mubr.f32.mxu0 %v3889_v19  ;;  %1992 = vmatprep.mubr.f32.mxu1 %v3063_v0 }
 0x2ee   : > { %1993 = vmatmul.mubr.f32.gmra.mxu1 %v1416_v60  ;;  %2814 = vmatmul.mubr.f32.vlgmr.msra.gmra.mxu0 %v3889_v19 }
 0x2ef   : > { %2816 = vmatprep.mubr.f32.mxu0 %v3899_v27  ;;  %2834 = vmatprep.mubr.f32.mxu1 %v3988_v17 }
 0x2f2   : > { %2817 = vmatmul.mubr.f32.gmra.mxu0 %v3899_v27  ;;  %2835 = vmatmul.mubr.f32.vlgmr.msra.gmra.mxu1 %v3988_v17 }
 0x2f3   : > { %2819 = vmatprep.mubr.f32.mxu0 %v3913_v37  ;;  %2837 = vmatprep.mubr.f32.mxu1 %v4001_v25 }
 0x2f6   : > { %2820 = vmatmul.mubr.f32.gmra.mxu0 %v3913_v37  ;;  %2838 = vmatmul.mubr.f32.gmra.mxu1 %v4001_v25 }
 0x2f7   : > { %2822 = vmatprep.mubr.f32.mxu0 %v3928_v45  ;;  %2840 = vmatprep.mubr.f32.mxu1 %v4014_v33 }
 0x2fa   : > { %2823 = vmatmul.mubr.f32.gmra.mxu0 %v3928_v45  ;;  %2841 = vmatmul.mubr.f32.gmra.mxu1 %v4014_v33 }
 0x2fb   : > { %2825 = vmatprep.mubr.f32.mxu0 %v3943_v63  ;;  %2843 = vmatprep.mubr.f32.mxu1 %v1414_v43 }
 0x2fe   : > { %2826 = vmatmul.mubr.f32.gmra.mxu0 %v3943_v63  ;;  %2844 = vmatmul.mubr.f32.gmra.mxu1 %v1414_v43 }
 0x2ff   : > { %2828 = vmatprep.mubr.f32.mxu0 %v3958_v5  ;;  %2846 = vmatprep.mubr.f32.mxu1 %v1415_v58 }
 0x302   : > { %2829 = vmatmul.mubr.f32.gmra.mxu0 %v3958_v5  ;;  %2847 = vmatmul.mubr.f32.gmra.mxu1 %v1415_v58 }
 0x303   : > { %2831 = vmatprep.mubr.f32.mxu0 %v3973_v12  ;;  %2849 = vmatprep.mubr.f32.mxu1 %v1416_v60 }
 0x306   : > { %2832 = vmatmul.mubr.f32.gmra.mxu0 %v3973_v12  ;;  %2850 = vmatmul.mubr.f32.gmra.mxu1 %v1416_v60 }
 0x307   : > { %2852 = vmatprep.mubr.f32.mxu1 %v3063_v0 }
 0x30a   : > { %2853 = vmatmul.mubr.f32.gmra.mxu1 %v3063_v0 }
 0x342   : > { %v1659_v19 = vpop.f32.mrf.mxu0  ;;  %v4055_v27 = vpop.f32.mrf.mxu1 }
 0x344   : > { %v1661_v37 = vpop.f32.mrf.mxu0  ;;  %v1861_v45 = vpop.f32.mrf.mxu1 }
 0x346   : > { %v1664_v61 = vpop.f32.mrf.mxu0  ;;  %v1864_v62 = vpop.f32.mrf.mxu1 }
 0x347   : > { %v4057_v63 = vadd.f32 %v1864_v62, %v1659_v19 }
 0x348   : > { %v1666_v50 = vpop.f32.mrf.mxu0  ;;  %v1866_v1 = vpop.f32.mrf.mxu1 }
 0x34a   : > { %v1669_v2 = vpop.f32.mrf.mxu0  ;;  %v1869_v3 = vpop.f32.mrf.mxu1 }
 0x34b   : > { %v4059_v51 = vadd.f32 %v1869_v3, %v1664_v61 }
 0x34c   : > { %v1671_v4 = vpop.f32.mrf.mxu0  ;;  %v1871_v5 = vpop.f32.mrf.mxu1 }
 0x34e   : > { %v1674_v42 = vpop.f32.mrf.mxu0  ;;  %v1874_v6 = vpop.f32.mrf.mxu1 }
 0x34f   : > { %v4061_v0 = vadd.f32 %v1874_v6, %v1669_v2 }
 0x350   : > { %v1676_v7 = vpop.f32.mrf.mxu0  ;;  %v1876_v8 = vpop.f32.mrf.mxu1 }
 0x352   : > { %v1679_v9 = vpop.f32.mrf.mxu0  ;;  %v1879_v52 = vpop.f32.mrf.mxu1 }
 0x353   : > { %v4063_v10 = vadd.f32 %v1879_v52, %v1674_v42 }
 0x354   : > { %v1681_v11 = vpop.f32.mrf.mxu0  ;;  %v1881_v12 = vpop.f32.mrf.mxu1 }
 0x356   : > { %v1684_v53 = vpop.f32.mrf.mxu0  ;;  %v1884_v13 = vpop.f32.mrf.mxu1 }
 0x357   : > { %v4065_v14 = vadd.f32 %v1884_v13, %v1679_v9 }
 0x358   : > { %v1686_v15 = vpop.f32.mrf.mxu0  ;;  %v1886_v54 = vpop.f32.mrf.mxu1 }
 0x35a   : > { %v1689_v16 = vpop.f32.mrf.mxu0  ;;  %v1889_v17 = vpop.f32.mrf.mxu1 }
 0x35b   : > { %v4067_v55 = vadd.f32 %v1889_v17, %v1684_v53 }
 0x35c   : > { %v1691_v18 = vpop.f32.mrf.mxu0  ;;  %v1891_v20 = vpop.f32.mrf.mxu1 }
 0x35e   : > { %v1694_v21 = vpop.f32.mrf.mxu0  ;;  %v1894_v22 = vpop.f32.mrf.mxu1 }
 0x35f   : > { %v4069_v56 = vadd.f32 %v1894_v22, %v1689_v16 }
 0x360   : > { %v1696_v23 = vpop.f32.mrf.mxu0  ;;  %v1896_v24 = vpop.f32.mrf.mxu1 }
 0x362   : > { %v1699_v25 = vpop.f32.mrf.mxu0  ;;  %v1899_v26 = vpop.f32.mrf.mxu1 }
 0x363   : > { %v4071_v28 = vadd.f32 %v1899_v26, %v1694_v21 }
 0x364   : > { %v1701_v57 = vpop.f32.mrf.mxu0  ;;  %v1901_v29 = vpop.f32.mrf.mxu1 }
 0x366   : > { %v1704_v30 = vpop.f32.mrf.mxu0  ;;  %v1904_v31 = vpop.f32.mrf.mxu1 }
 0x367   : > { %v4073_v33 = vadd.f32 %v1904_v31, %v1699_v25 }
 0x368   : > { %v1706_v34 = vpop.f32.mrf.mxu0  ;;  %v1906_v35 = vpop.f32.mrf.mxu1 }
 0x36a   : > { %v1709_v36 = vpop.f32.mrf.mxu0  ;;  %v1909_v38 = vpop.f32.mrf.mxu1 }
 0x36b   : > { %v4075_v39 = vadd.f32 %v1909_v38, %v1704_v30 }
 0x36c   : > { %v1711_v40 = vpop.f32.mrf.mxu0  ;;  %v1911_v41 = vpop.f32.mrf.mxu1 }
 0x36e   : > { %v1714_v43 = vpop.f32.mrf.mxu0  ;;  %v1914_v44 = vpop.f32.mrf.mxu1 }
 0x36f   : > { %v4077_v46 = vadd.f32 %v1914_v44, %v1709_v36 }
 0x370   : > { %v1716_v47 = vpop.f32.mrf.mxu0  ;;  %v1916_v48 = vpop.f32.mrf.mxu1 }
 0x372   : > { %v1719_v58 = vpop.f32.mrf.mxu0  ;;  %v1919_v59 = vpop.f32.mrf.mxu1 }
 0x373   : > { %v4079_v49 = vadd.f32 %v1919_v59, %v1714_v43 }
 0x374   : > { %v1721_v60 = vpop.f32.mrf.mxu0  ;;  %v1921_v19 = vpop.f32.mrf.mxu1 }
 0x376   : > { %v4081_v37 = vpop.f32.mrf.mxu0  ;;  %v1924_v45 = vpop.f32.mrf.mxu1 }
 0x377   : > { %v4083_v61 = vadd.f32 %v1924_v45, %v1719_v58 }
 0x378   : > { %v1726_v62 = vpop.f32.mrf.mxu0  ;;  %v1926_v50 = vpop.f32.mrf.mxu1 }
 0x37a   : > { %v1729_v1 = vpop.f32.mrf.mxu0  ;;  %v4085_v2 = vpop.f32.mrf.mxu1 }
 0x37c   : > { %v1731_v3 = vpop.f32.mrf.mxu0  ;;  %v1931_v4 = vpop.f32.mrf.mxu1 }
 0x37e   : > { %v4087_v5 = vpop.f32.mrf.mxu0  ;;  %v1934_v42 = vpop.f32.mrf.mxu1 }
 0x380   : > { %v1736_v6 = vpop.f32.mrf.mxu0  ;;  %v1936_v7 = vpop.f32.mrf.mxu1 }
 0x382   : > { %v4089_v8 = vpop.f32.mrf.mxu0  ;;  %v1939_v9 = vpop.f32.mrf.mxu1 }
 0x384   : > { %v1741_v52 = vpop.f32.mrf.mxu0  ;;  %v1941_v11 = vpop.f32.mrf.mxu1 }
 0x386   : > { %v4091_v12 = vpop.f32.mrf.mxu0  ;;  %v1944_v53 = vpop.f32.mrf.mxu1 }
 0x388   : > { %v1746_v13 = vpop.f32.mrf.mxu0  ;;  %v1946_v15 = vpop.f32.mrf.mxu1 }
 0x389   : > { %v1860_v13 = vadd.f32 %v4055_v27, %v4012_v32 }
 0x38a   : > { %v4093_v54 = vpop.f32.mrf.mxu0  ;;  %v1949_v16 = vpop.f32.mrf.mxu1 }
 0x38c   : > { %v1751_v17 = vpop.f32.mrf.mxu0  ;;  %v1951_v18 = vpop.f32.mrf.mxu1 }
 0x38e   : > { %v4095_v20 = vpop.f32.mrf.mxu0  ;;  %v4097_v21 = vpop.f32.mrf.mxu1 }
 0x390   : > { %v1756_v22 = vpop.f32.mrf.mxu0  ;;  %v1956_v23 = vpop.f32.mrf.mxu1 }
 0x391   : > { %v1935_v22 = vadd.f32 %v1934_v42, %v1729_v1  ;;  %v1945_v42 = vadd.f32 %v1944_v53, %v4089_v8 }
 0x392   : > { %v4099_v24 = vpop.f32.mrf.mxu0  ;;  %v4101_v25 = vpop.f32.mrf.mxu1 }
 0x394   : > { %v1761_v26 = vpop.f32.mrf.mxu0  ;;  %v1961_v57 = vpop.f32.mrf.mxu1 }
 0x396   : > { %v4103_v29 = vpop.f32.mrf.mxu0  ;;  %v4105_v30 = vpop.f32.mrf.mxu1 }
 0x398   : > { %v1766_v31 = vpop.f32.mrf.mxu0  ;;  %v1966_v34 = vpop.f32.mrf.mxu1 }
 0x39a   : > { %v4107_v35 = vpop.f32.mrf.mxu0  ;;  %v4109_v36 = vpop.f32.mrf.mxu1 }
 0x39c   : > { %v1771_v38 = vpop.f32.mrf.mxu0  ;;  %v1971_v40 = vpop.f32.mrf.mxu1 }
 0x39e   : > { %v4111_v41 = vpop.f32.mrf.mxu0  ;;  %v4113_v43 = vpop.f32.mrf.mxu1 }
 0x3a0   : > { %v1776_v44 = vpop.f32.mrf.mxu0  ;;  %v1976_v47 = vpop.f32.mrf.mxu1 }
 0x3a1   : > { %v1930_v47 = vadd.f32 %v4085_v2, %v4081_v37 }
 0x3a2   : > { %v4115_v48 = vpop.f32.mrf.mxu0  ;;  %v4117_v58 = vpop.f32.mrf.mxu1 }
 0x3a4   : > { %v1781_v59 = vpop.f32.mrf.mxu0  ;;  %v1981_v60 = vpop.f32.mrf.mxu1 }
 0x3a5   : > { %v1940_v59 = vadd.f32 %v1939_v9, %v4087_v5  ;;  %v1955_v5 = vadd.f32 %v4097_v21, %v4093_v54  ;;  %v1965_v21 = vadd.f32 %v4105_v30, %v4099_v24 }
 0x3a6   : > { %v4119_v19 = vpop.f32.mrf.mxu0  ;;  %v4121_v45 = vpop.f32.mrf.mxu1 }
 0x3a8   : > { %v1786_v62 = vpop.f32.mrf.mxu0  ;;  %v1986_v50 = vpop.f32.mrf.mxu1 }
 0x3a9   : > { %v1950_v62 = vadd.f32 %v1949_v16, %v4091_v12 }
 0x3aa   : > { %v4123_v3 = vpop.f32.mrf.mxu0  ;;  %v4125_v4 = vpop.f32.mrf.mxu1 }
 0x3ac   : > { %v1791_v6 = vpop.f32.mrf.mxu0  ;;  %v1991_v7 = vpop.f32.mrf.mxu1 }
 0x3ae   : > { %v4127_v52 = vpop.f32.mrf.mxu1  ;;  %v2815_v11 = vpop.f32.mrf.mxu0 }
 0x3af   : > { %v2070_v15 = vadd.f32 %v2815_v11, %v4057_v63 }
 0x3b0   : > { %v1996_v17 = vpop.f32.mrf.mxu1  ;;  %v2064_v18 = vpop.f32.mrf.mxu0 }
 0x3b1   : > { %v2204_v23 = vsub.f32 0.0, %v2070_v15  ;;  %v2065_v26 = vadd.f32 %v2064_v18, %v1860_v13 }
 0x3b2   : > { %v2818_v57 = vpop.f32.mrf.mxu0  ;;  %v2836_v31 = vpop.f32.mrf.mxu1 }
 0x3b3   : > { %v2233_v34 = vmul.f32 1.442695, %v2204_v23  ;;  %v2203_v38 = vsub.f32 0.0, %v2065_v26  ;;  %v2080_v40 = vadd.f32 %v2818_v57, %v4061_v0  ;;  %v2140_v44 = vadd.f32 %v2836_v31, %v1935_v22 }
 0x3b4   : > { %v2074_v32 = vpop.f32.mrf.mxu0  ;;  %v2134_v27 = vpop.f32.mrf.mxu1 }
 0x3b5   : > { %2910 = vpow2.f32 %v2233_v34  ;;  %v2231_v63 = vmul.f32 1.442695, %v2203_v38  ;;  %v2206_v60 = vsub.f32 0.0, %v2080_v40  ;;  %v2218_v1 = vsub.f32 0.0, %v2140_v44 }
 0x3b6   : > { %v2075_v50 = vadd.f32 %v2074_v32, %v4059_v51  ;;  %v2135_v6 = vadd.f32 %v2134_v27, %v1930_v47  ;;  %v2821_v0 = vpop.f32.mrf.mxu0  ;;  %v2839_v7 = vpop.f32.mrf.mxu1 }
 0x3b7   : > { %2912 = vpow2.f32 %v2231_v63  ;;  %v2237_v11 = vmul.f32 1.442695, %v2206_v60  ;;  %v2261_v37 = vmul.f32 1.442695, %v2218_v1  ;;  %v2090_v2 = vadd.f32 %v2821_v0, %v4065_v14 }
 0x3b8   : > { %v2205_v9 = vsub.f32 0.0, %v2075_v50  ;;  %v2217_v13 = vsub.f32 0.0, %v2135_v6  ;;  %v2150_v15 = vadd.f32 %v2839_v7, %v1945_v42  ;;  %v2084_v17 = vpop.f32.mrf.mxu0  ;;  %v2144_v8 = vpop.f32.mrf.mxu1 }
 0x3b9   : > { %2914 = vpow2.f32 %v2237_v11  ;;  %v2208_v12 = vsub.f32 0.0, %v2090_v2  ;;  %v2085_v51 = vadd.f32 %v2084_v17, %v4063_v10  ;;  %v2145_v53 = vadd.f32 %v2144_v8, %v1940_v59 }
 0x3ba   : > { %2916 = vpow2.f32 %v2261_v37  ;;  %v2235_v16 = vmul.f32 1.442695, %v2205_v9  ;;  %v2259_v18 = vmul.f32 1.442695, %v2217_v13  ;;  %v2220_v22 = vsub.f32 0.0, %v2150_v15  ;;  %v2824_v23 = vpop.f32.mrf.mxu0  ;;  %v2842_v26 = vpop.f32.mrf.mxu1 }
 0x3bb   : > { %v2241_v14 = vmul.f32 1.442695, %v2208_v12  ;;  %v2207_v57 = vsub.f32 0.0, %v2085_v51  ;;  %v2219_v31 = vsub.f32 0.0, %v2145_v53  ;;  %v2100_v54 = vadd.f32 %v2824_v23, %v4069_v56 }
 0x3bc   : > { %2918 = vpow2.f32 %v2235_v16  ;;  %v2265_v34 = vmul.f32 1.442695, %v2220_v22  ;;  %v2160_v38 = vadd.f32 %v2842_v26, %v1955_v5  ;;  %v2094_v40 = vpop.f32.mrf.mxu0  ;;  %v2154_v10 = vpop.f32.mrf.mxu1 }
 0x3bd   : > { %2920 = vpow2.f32 %v2259_v18  ;;  %v2239_v44 = vmul.f32 1.442695, %v2207_v57  ;;  %v2263_v47 = vmul.f32 1.442695, %v2219_v31  ;;  %v2210_v59 = vsub.f32 0.0, %v2100_v54 }
 0x3be   : > { %2922 = vpow2.f32 %v2241_v14  ;;  %v2222_v32 = vsub.f32 0.0, %v2160_v38  ;;  %v2095_v27 = vadd.f32 %v2094_v40, %v4067_v55  ;;  %v2155_v63 = vadd.f32 %v2154_v10, %v1950_v62  ;;  %v2827_v60 = vpop.f32.mrf.mxu0  ;;  %v2845_v1 = vpop.f32.mrf.mxu1 }
 0x3bf   : > { %2924 = vpow2.f32 %v2265_v34  ;;  %v2245_v56 = vmul.f32 1.442695, %v2210_v59  ;;  %v2110_v24 = vadd.f32 %v2827_v60, %v4073_v33  ;;  %v2170_v30 = vadd.f32 %v2845_v1, %v1965_v21 }
 0x3c0   : > { %2926 = vpow2.f32 %v2239_v44  ;;  %v2269_v42 = vmul.f32 1.442695, %v2222_v32  ;;  %v2209_v50 = vsub.f32 0.0, %v2095_v27  ;;  %v2221_v6 = vsub.f32 0.0, %v2155_v63  ;;  %v2164_v0 = vpop.f32.mrf.mxu1  ;;  %v2104_v11 = vpop.f32.mrf.mxu0 }
 0x3c1   : > { %2928 = vpow2.f32 %v2263_v47  ;;  %v2212_v7 = vsub.f32 0.0, %v2110_v24  ;;  %v2224_v9 = vsub.f32 0.0, %v2170_v30  ;;  %v2105_v22 = vadd.f32 %v2104_v11, %v4071_v28 }
 0x3c2   : > { %v2911_v37 = vpop.eup %2910  ;;  %2930 = vpow2.f32 %v2245_v56  ;;  %v2243_v2 = vmul.f32 1.442695, %v2209_v50  ;;  %v2267_v55 = vmul.f32 1.442695, %v2221_v6  ;;  %v2848_v62 = vpop.f32.mrf.mxu1  ;;  %v1960_v14 = vadd.f32 %v4101_v25, %v4095_v20 }
 0x3c3   : > { %v2288_v5 = vadd.f32 1.0, %v2911_v37  ;;  %2932 = vpow2.f32 %v2269_v42  ;;  %v2249_v33 = vmul.f32 1.442695, %v2212_v7  ;;  %v2830_v8 = vpop.f32.mrf.mxu0  ;;  %v2273_v16 = vmul.f32 1.442695, %v2224_v9 }
 0x3c4   : > { %v2913_v13 = vpop.eup %2912  ;;  %2934 = vpow2.f32 %v2243_v2  ;;  %v2174_v15 = vpop.f32.mrf.mxu1  ;;  %v1970_v54 = vadd.f32 %v4109_v36, %v4103_v29  ;;  %v1975_v38 = vadd.f32 %v4113_v43, %v4107_v35  ;;  %v2165_v40 = vadd.f32 %v2164_v0, %v1960_v14 }
 0x3c5   : > { %2936 = vrcp.f32 %v2288_v5  ;;  %v2287_v17 = vadd.f32 1.0, %v2913_v13  ;;  %v2114_v57 = vpop.f32.mrf.mxu0  ;;  %v2211_v25 = vsub.f32 0.0, %v2105_v22  ;;  %v2120_v44 = vadd.f32 %v2830_v8, %v4077_v46 }
 0x3c6   : > { %v2915_v12 = vpop.eup %2914  ;;  %2938 = vpow2.f32 %v2267_v55  ;;  %v2851_v23 = vpop.f32.mrf.mxu1  ;;  %v1980_v29 = vadd.f32 %v4117_v58, %v4111_v41  ;;  %v2180_v32 = vadd.f32 %v2848_v62, %v1975_v38  ;;  %v1985_v43 = vadd.f32 %v4121_v45, %v4115_v48 }
 0x3c7   : > { %v2917_v51 = vpop.eup %2916  ;;  %2940 = vrcp.f32 %v2287_v17  ;;  %v2290_v53 = vadd.f32 1.0, %v2915_v12  ;;  %v2833_v27 = vpop.f32.mrf.mxu0  ;;  %v1990_v63 = vadd.f32 %v4125_v4, %v4119_v19  ;;  %v2223_v56 = vsub.f32 0.0, %v2165_v40 }
 0x3c8   : > { %v2302_v18 = vadd.f32 1.0, %v2917_v51  ;;  %2942 = vpow2.f32 %v2249_v33  ;;  %v2184_v47 = vpop.f32.mrf.mxu1  ;;  %v2115_v24 = vadd.f32 %v2114_v57, %v4075_v39  ;;  %v2247_v48 = vmul.f32 1.442695, %v2211_v25 }
 0x3c9   : > { %v2919_v26 = vpop.eup %2918  ;;  %2944 = vrcp.f32 %v2290_v53  ;;  %v2214_v45 = vsub.f32 0.0, %v2120_v44  ;;  %v2226_v42 = vsub.f32 0.0, %v2180_v32  ;;  %v2175_v50 = vadd.f32 %v2174_v15, %v1970_v54  ;;  %v2124_v6 = vpop.f32.mrf.mxu0 }
 0x3ca   : > { %v2921_v31 = vpop.eup %2920  ;;  %2946 = vrcp.f32 %v2302_v18  ;;  %v2289_v21 = vadd.f32 1.0, %v2919_v26  ;;  %v2854_v19 = vpop.f32.mrf.mxu1  ;;  %v1995_v39 = vadd.f32 %v4127_v52, %v4123_v3  ;;  %v2130_v11 = vadd.f32 %v2833_v27, %v4083_v61 }
 0x3cb   : > { %v2923_v34 = vpop.eup %2922  ;;  %v2301_v28 = vadd.f32 1.0, %v2921_v31  ;;  %2948 = vpow2.f32 %v2273_v16  ;;  %v2271_v2 = vmul.f32 1.442695, %v2223_v56  ;;  %v2213_v55 = vsub.f32 0.0, %v2115_v24 }
 0x3cc   : > { %v2925_v10 = vpop.eup %2924  ;;  %2950 = vrcp.f32 %v2289_v21  ;;  %v2292_v20 = vadd.f32 1.0, %v2923_v34  ;;  %v2190_v62 = vadd.f32 %v2851_v23, %v1985_v43  ;;  %v2253_v13 = vmul.f32 1.442695, %v2214_v45  ;;  %v2194_v3 = vpop.f32.mrf.mxu1 }
 0x3cd   : > { %v2927_v59 = vpop.eup %2926  ;;  %2952 = vrcp.f32 %v2301_v28  ;;  %v2304_v36 = vadd.f32 1.0, %v2925_v10  ;;  %v2125_v33 = vadd.f32 %v2124_v6, %v4079_v49  ;;  %v2277_v61 = vmul.f32 1.442695, %v2226_v42 }
 0x3ce   : > { %v2929_v35 = vpop.eup %2928  ;;  %2954 = vrcp.f32 %v2292_v20  ;;  %v2291_v60 = vadd.f32 1.0, %v2927_v59  ;;  %v2225_v15 = vsub.f32 0.0, %v2175_v50  ;;  %v2185_v17 = vadd.f32 %v2184_v47, %v1980_v29 }
 0x3cf   : > { %v2931_v1 = vpop.eup %2930  ;;  %2956 = vrcp.f32 %v2304_v36  ;;  %v2303_v46 = vadd.f32 1.0, %v2929_v35  ;;  %v2216_v51 = vsub.f32 0.0, %v2130_v11  ;;  %v2200_v53 = vadd.f32 %v2854_v19, %v1995_v39 }
 0x3d0   : > { %v2933_v41 = vpop.eup %2932  ;;  %2958 = vrcp.f32 %v2291_v60  ;;  %v2294_v58 = vadd.f32 1.0, %v2931_v1  ;;  %v2228_v49 = vsub.f32 0.0, %v2190_v62  ;;  %v2195_v18 = vadd.f32 %v2194_v3, %v1990_v63 }
 0x3d1   : > { %v2935_v4 = vpop.eup %2934  ;;  %2960 = vrcp.f32 %v2303_v46  ;;  %v2306_v30 = vadd.f32 1.0, %v2933_v41  ;;  %v2251_v23 = vmul.f32 1.442695, %v2213_v55  ;;  %v2215_v26 = vsub.f32 0.0, %v2125_v33 }
 0x3d2   : > { %v2937_v0 = vpop.eup %2936  ;;  %2962 = vrcp.f32 %v2294_v58  ;;  %v2293_v7 = vadd.f32 1.0, %v2935_v4  ;;  %v2275_v31 = vmul.f32 1.442695, %v2225_v15  ;;  %v2227_v54 = vsub.f32 0.0, %v2185_v17 }
 0x3d3   : > { %v2939_v37 = vpop.eup %2938  ;;  %2345 = vst.msk [vmem:[%s4167_s19 + $0x8] sm:$0xff] %vm2343_vm15, %v2937_v0  ;;  %2964 = vrcp.f32 %v2306_v30  ;;  %v2257_v34 = vmul.f32 1.442695, %v2216_v51  ;;  %v2230_v38 = vsub.f32 0.0, %v2200_v53  ;;  %v2281_v40 = vmul.f32 1.442695, %v2228_v49 }
 0x3d4   : > { %v2941_v5 = vpop.eup %2940  ;;  %2966 = vrcp.f32 %v2293_v7  ;;  %v2305_v9 = vadd.f32 1.0, %v2939_v37  ;;  %v2229_v10 = vsub.f32 0.0, %v2195_v18  ;;  %v2255_v25 = vmul.f32 1.442695, %v2215_v26 }
 0x3d5   : > { %v2943_v52 = vpop.eup %2942  ;;  %2344 = vst.msk [vmem:[%s4167_s19] sm:$0xff] %vm2343_vm15, %v2941_v5  ;;  %2968 = vpow2.f32 %v2247_v48  ;;  %v2279_v47 = vmul.f32 1.442695, %v2227_v54  ;;  %v2285_v29 = vmul.f32 1.442695, %v2230_v38 }
 0x3d6   : > { %v2945_v8 = vpop.eup %2944  ;;  %2970 = vrcp.f32 %v2305_v9  ;;  %v2296_v12 = vadd.f32 1.0, %v2943_v52  ;;  %v2283_v32 = vmul.f32 1.442695, %v2229_v10 }
 0x3d7   : > { %v2947_v16 = vpop.eup %2946  ;;  %2347 = vst.msk [vmem:[%s4167_s19 + $0x18] sm:$0xff] %vm2343_vm15, %v2945_v8  ;;  %2972 = vpow2.f32 %v2271_v2 }
 0x3d8   : > { %v2949_v22 = vpop.eup %2948  ;;  %2359 = vst.msk [vmem:[%s4167_s19 + $0x78] sm:$0xff] %vm2343_vm15, %v2947_v16  ;;  %2974 = vrcp.f32 %v2296_v12 }
 0x3d9   : > { %v2951_v14 = vpop.eup %2950  ;;  %v2308_v57 = vadd.f32 1.0, %v2949_v22  ;;  %2976 = vpow2.f32 %v2253_v13 }
 0x3da   : > { %v2953_v21 = vpop.eup %2952  ;;  %2346 = vst.msk [vmem:[%s4167_s19 + $0x10] sm:$0xff] %vm2343_vm15, %v2951_v14  ;;  %2978 = vpow2.f32 %v2277_v61 }
 0x3db   : > { %v2955_v28 = vpop.eup %2954  ;;  %2358 = vst.msk [vmem:[%s4167_s19 + $0x70] sm:$0xff] %vm2343_vm15, %v2953_v21  ;;  %2980 = vrcp.f32 %v2308_v57 }
 0x3dc   : > { %v2957_v20 = vpop.eup %2956  ;;  %2349 = vst.msk [vmem:[%s4167_s19 + $0x28] sm:$0xff] %vm2343_vm15, %v2955_v28  ;;  %2982 = vpow2.f32 %v2251_v23 }
 0x3dd   : > { %v2959_v44 = vpop.eup %2958  ;;  %2361 = vst.msk [vmem:[%s4167_s19 + $0x88] sm:$0xff] %vm2343_vm15, %v2957_v20  ;;  %2984 = vpow2.f32 %v2275_v31 }
 0x3de   : > { %v2961_v59 = vpop.eup %2960  ;;  %2348 = vst.msk [vmem:[%s4167_s19 + $0x20] sm:$0xff] %vm2343_vm15, %v2959_v44  ;;  %2986 = vpow2.f32 %v2257_v34 }
 0x3df   : > { %v2963_v36 = vpop.eup %2962  ;;  %2360 = vst.msk [vmem:[%s4167_s19 + $0x80] sm:$0xff] %vm2343_vm15, %v2961_v59  ;;  %2988 = vpow2.f32 %v2281_v40 }
 0x3e0   : > { %v2965_v27 = vpop.eup %2964  ;;  %2351 = vst.msk [vmem:[%s4167_s19 + $0x38] sm:$0xff] %vm2343_vm15, %v2963_v36  ;;  %2990 = vpow2.f32 %v2255_v25 }
 0x3e1   : > { %v2967_v35 = vpop.eup %2966  ;;  %2363 = vst.msk [vmem:[%s4167_s19 + $0x98] sm:$0xff] %vm2343_vm15, %v2965_v27  ;;  %2992 = vpow2.f32 %v2279_v47 }
 0x3e2   : > { %v2969_v43 = vpop.eup %2968  ;;  %2350 = vst.msk [vmem:[%s4167_s19 + $0x30] sm:$0xff] %vm2343_vm15, %v2967_v35  ;;  %2994 = vpow2.f32 %v2285_v29 }
 0x3e3   : > { %v2971_v63 = vpop.eup %2970  ;;  %v2295_v60 = vadd.f32 1.0, %v2969_v43  ;;  %2996 = vpow2.f32 %v2283_v32 }
 0x3e4   : > { %v2973_v1 = vpop.eup %2972  ;;  %2362 = vst.msk [vmem:[%s4167_s19 + $0x90] sm:$0xff] %vm2343_vm15, %v2971_v63 }
 0x3e5   : > { %v2975_v46 = vpop.eup %2974  ;;  %2998 = vrcp.f32 %v2295_v60  ;;  %v2307_v56 = vadd.f32 1.0, %v2973_v1 }
 0x3e6   : > { %v2977_v24 = vpop.eup %2976  ;;  %2353 = vst.msk [vmem:[%s4167_s19 + $0x48] sm:$0xff] %vm2343_vm15, %v2975_v46 }
 0x3e7   : > { %v2979_v41 = vpop.eup %2978  ;;  %3000 = vrcp.f32 %v2307_v56  ;;  %v2298_v58 = vadd.f32 1.0, %v2977_v24 }
 0x3e8   : > { %v2981_v48 = vpop.eup %2980  ;;  %v2310_v45 = vadd.f32 1.0, %v2979_v41 }
 0x3e9   : > { %v2983_v19 = vpop.eup %2982  ;;  %2365 = vst.msk [vmem:[%s4167_s19 + $0xa8] sm:$0xff] %vm2343_vm15, %v2981_v48  ;;  %3002 = vrcp.f32 %v2298_v58 }
 0x3ea   : > { %v2985_v4 = vpop.eup %2984  ;;  %3004 = vrcp.f32 %v2310_v45  ;;  %v2297_v30 = vadd.f32 1.0, %v2983_v19 }
 0x3eb   : > { %v2987_v42 = vpop.eup %2986  ;;  %v2309_v50 = vadd.f32 1.0, %v2985_v4 }
 0x3ec   : > { %v2989_v6 = vpop.eup %2988  ;;  %3006 = vrcp.f32 %v2297_v30  ;;  %v2300_v0 = vadd.f32 1.0, %v2987_v42 }
 0x3ed   : > { %v2991_v39 = vpop.eup %2990  ;;  %3008 = vrcp.f32 %v2309_v50  ;;  %v2312_v7 = vadd.f32 1.0, %v2989_v6 }
 0x3ee   : > { %v2993_v11 = vpop.eup %2992  ;;  %3010 = vrcp.f32 %v2300_v0  ;;  %v2299_v37 = vadd.f32 1.0, %v2991_v39 }
 0x3ef   : > { %v2995_v2 = vpop.eup %2994  ;;  %3012 = vrcp.f32 %v2312_v7  ;;  %v2311_v55 = vadd.f32 1.0, %v2993_v11 }
 0x3f0   : > { %v2997_v62 = vpop.eup %2996  ;;  %3014 = vrcp.f32 %v2299_v37  ;;  %v2314_v5 = vadd.f32 1.0, %v2995_v2 }
 0x3f1   : > { %3016 = vrcp.f32 %v2311_v55  ;;  %v2313_v9 = vadd.f32 1.0, %v2997_v62 }
 0x3f2   : > { %v2999_v13 = vpop.eup %2998  ;;  %3018 = vrcp.f32 %v2314_v5 }
 0x3f3   : > { %2352 = vst.msk [vmem:[%s4167_s19 + $0x40] sm:$0xff] %vm2343_vm15, %v2999_v13  ;;  %3020 = vrcp.f32 %v2313_v9 }
 0x3f4   : > { %v3001_v33 = vpop.eup %3000 }
 0x3f5   : > { %2364 = vst.msk [vmem:[%s4167_s19 + $0xa0] sm:$0xff] %vm2343_vm15, %v3001_v33 }
 0x3f6   : > { %v3003_v3 = vpop.eup %3002 }
 0x3f7   : > { %v3005_v52 = vpop.eup %3004  ;;  %2355 = vst.msk [vmem:[%s4167_s19 + $0x58] sm:$0xff] %vm2343_vm15, %v3003_v3 }
 0x3f8   : > { %2367 = vst.msk [vmem:[%s4167_s19 + $0xb8] sm:$0xff] %vm2343_vm15, %v3005_v52 }
 0x3f9   : > { %v3007_v61 = vpop.eup %3006 }
 0x3fa   : > { %v3009_v15 = vpop.eup %3008  ;;  %2354 = vst.msk [vmem:[%s4167_s19 + $0x50] sm:$0xff] %vm2343_vm15, %v3007_v61 }
 0x3fb   : > { %v3011_v17 = vpop.eup %3010  ;;  %2366 = vst.msk [vmem:[%s4167_s19 + $0xb0] sm:$0xff] %vm2343_vm15, %v3009_v15 }
 0x3fc   : > { %v3013_v8 = vpop.eup %3012  ;;  %2357 = vst.msk [vmem:[%s4167_s19 + $0x68] sm:$0xff] %vm2343_vm15, %v3011_v17 }
 0x3fd   : > { %v3015_v12 = vpop.eup %3014  ;;  %2369 = vst.msk [vmem:[%s4167_s19 + $0xc8] sm:$0xff] %vm2343_vm15, %v3013_v8 }
 0x3fe   : > { %v3017_v51 = vpop.eup %3016  ;;  %2356 = vst.msk [vmem:[%s4167_s19 + $0x60] sm:$0xff] %vm2343_vm15, %v3015_v12 }
 0x3ff   : > { %v3019_v53 = vpop.eup %3018  ;;  %2368 = vst.msk [vmem:[%s4167_s19 + $0xc0] sm:$0xff] %vm2343_vm15, %v3017_v51 }
 0x400   : > { %v3021_v16 = vpop.eup %3020  ;;  %2371 = vst.msk [vmem:[%s4167_s19 + $0xd8] sm:$0xff] %vm2343_vm15, %v3019_v53 }
 0x401   : > { %2370 = vst.msk [vmem:[%s4167_s19 + $0xd0] sm:$0xff] %vm2343_vm15, %v3021_v16 }
 0x402 PF: > { %s19_s27 = sadd.s32 1, %s3058_s27  }
 0x403   : > { %p16_p1 = scmp.ge.s32.totalorder %s19_s27, 4  }
 0x405   :  { %18 = sbr.rel (!%p16_p1) target bundleno = 1 (0x1), region = 87 }
 0x40a   :  { %2393 = vsyncpa [#allocation6], 1 }
 0x40b   :  { %2395 = vsyncpa [#allocation6 + $0x1], 1 }

</bundles_post_ra>
